<compile_context>
chip_gen: v6e
topology: v6e:2x2x1
jax: 0.10.0
libtpu: 0.0.40
codegen_flags: <defaults>
</compile_context>

<pallas_src>
import jax
import jax.numpy as jnp
from jax.experimental import pallas as pl
from jax.experimental.pallas import tpu as pltpu


# ---------------------------------------------------------------------------
# Fused kernel: conv1 -> conv2 -> conv3 -> GRU -> relu -> MLP head
# Processes one batch row per grid step (grid=(B,), "parallel").
# ---------------------------------------------------------------------------
def fused_kernel(x_ref,                      # (L, Cin0)  squeezed batch row
                 cw1, cb1, cw2, cb2, cw3, cb3,   # conv weights (K*Cin, Cout), (1, Cout)
                 w_ih, w_hh, b_ih, b_hh,         # packed GRU weights (r|z|n)
                 hw1, hb1, hw2, hb2, wo, bo,     # MLP head
                 o_ref,                          # (L, output_size)
                 pad_scr,                        # (L + 2*pad, Cmax) VMEM scratch
                 rnn_scr):                       # (L, H) VMEM scratch
    L, c_in0 = x_ref.shape
    K = cw1.shape[0] // c_in0
    pad = (K - 1) // 2
    H = w_hh.shape[0]

    # Zero the padded-activation scratch once; the pad rows are never written
    # again, the interior rows are overwritten before every read.
    pad_scr[...] = jnp.zeros_like(pad_scr)

    def conv_same(act, w_ref, b_ref):
        # act: (L, Cin) value; w_ref: (K*Cin, Cout); b_ref: (1, Cout)
        c_in = act.shape[-1]
        pad_scr[pad:pad + L, :c_in] = act
        # im2col: K shifted views concatenated along the lane dim -> one matmul
        taps = [pad_scr[k:k + L, :c_in] for k in range(K)]
        xcol = jnp.concatenate(taps, axis=-1)            # (L, K*Cin)
        return jnp.dot(xcol, w_ref[...],
                       preferred_element_type=jnp.float32) + b_ref[...]

    act = conv_same(x_ref[...], cw1, cb1)                # (L, C1)
    act = conv_same(act, cw2, cb2)                       # (L, C2)
    act = conv_same(act, cw3, cb3)                       # (L, C3)

    # ---- GRU (num_layers=1, unidirectional, h0 = 0) ----
    # Batched input projection over all timesteps: one (L, C)@(C, 3H) matmul.
    gi = jnp.dot(act, w_ih[...],
                 preferred_element_type=jnp.float32) + b_ih[...]   # (L, 3H)
    w_hh_v = w_hh[...]
    b_hh_v = b_hh[...]

    h = jnp.zeros((1, H), jnp.float32)
    for t in range(L):  # fully unrolled recurrence (L is small & static)
        gh = jnp.dot(h, w_hh_v,
                     preferred_element_type=jnp.float32) + b_hh_v  # (1, 3H)
        gi_t = gi[t:t + 1, :]                                      # (1, 3H)
        r = jax.nn.sigmoid(gi_t[:, :H] + gh[:, :H])
        z = jax.nn.sigmoid(gi_t[:, H:2 * H] + gh[:, H:2 * H])
        n = jnp.tanh(gi_t[:, 2 * H:] + r * gh[:, 2 * H:])
        h = (1.0 - z) * n + z * h
        rnn_scr[t:t + 1, :] = h

    # ---- Head: relu -> [Linear + relu] x2 -> Linear (dropout == identity) ----
    hh = jnp.maximum(rnn_scr[...], 0.0)                             # (L, H)
    h1 = jnp.maximum(jnp.dot(hh, hw1[...],
                             preferred_element_type=jnp.float32) + hb1[...], 0.0)
    h2 = jnp.maximum(jnp.dot(h1, hw2[...],
                             preferred_element_type=jnp.float32) + hb2[...], 0.0)
    o_ref[...] = jnp.dot(h2, wo[...],
                         preferred_element_type=jnp.float32) + bo[...]


# ---------------------------------------------------------------------------
# Wrapper: single fused pallas_call, grid over batch.
# ---------------------------------------------------------------------------
@jax.jit
def seq2seq_cnn_rnn_forward(x_ncl, params):
    # x_ncl: (B, input_size, seq_len) -- same layout as the PyTorch module input
    B, c_in0, L = x_ncl.shape
    x_blc = jnp.transpose(x_ncl, (0, 2, 1))           # NCL -> (B, L, C)

    K = params['cw1'].shape[0] // c_in0
    pad = (K - 1) // 2
    c_max = max(c_in0,
                params['cw2'].shape[0] // K,
                params['cw3'].shape[0] // K)
    H = params['w_hh'].shape[0]
    out_size = params['wo'].shape[1]

    weight_names = ['cw1', 'cb1', 'cw2', 'cb2', 'cw3', 'cb3',
                    'w_ih', 'w_hh', 'b_ih', 'b_hh',
                    'w1', 'b1', 'w2', 'b2', 'wo', 'bo']
    weights = [params[n] for n in weight_names]

    def full_spec(a):
        # Whole array, constant block index -> DMA'd once, resident in VMEM.
        return pl.BlockSpec(a.shape, lambda b: (0,) * a.ndim)

    out = pl.pallas_call(
        fused_kernel,
        out_shape=jax.ShapeDtypeStruct((B, L, out_size), jnp.float32),
        grid=(B,),
        in_specs=[pl.BlockSpec((None, L, c_in0), lambda b: (b, 0, 0))]
                 + [full_spec(w) for w in weights],
        out_specs=pl.BlockSpec((None, L, out_size), lambda b: (b, 0, 0)),
        scratch_shapes=[pltpu.VMEM((L + 2 * pad, c_max), jnp.float32),
                        pltpu.VMEM((L, H), jnp.float32)],
        compiler_params=pltpu.CompilerParams(
            dimension_semantics=("parallel",)),
    )(x_blc, *weights)
    return out


# ---------------------------------------------------------------------------
# Parameter setup (packed layouts: conv (K*Cin, Cout); GRU gates r|z|n packed)
# ---------------------------------------------------------------------------
def init_params(key, input_size, hidden_size, output_size, kernel_size,
                conv_layers, hidden_layers):
    keys = iter(jax.random.split(key, 32))

    def w(shape, scale=0.1):
        return scale * jax.random.normal(next(keys), shape, jnp.float32)

    p = {}
    c_in = input_size
    for i, c_out in enumerate(conv_layers, start=1):
        p[f'cw{i}'] = w((kernel_size * c_in, c_out))
        p[f'cb{i}'] = w((1, c_out))
        c_in = c_out
    C, H = conv_layers[-1], hidden_size
    p['w_ih'] = w((C, 3 * H))
    p['w_hh'] = w((H, 3 * H))
    p['b_ih'] = w((1, 3 * H))
    p['b_hh'] = w((1, 3 * H))
    p['w1'] = w((H, hidden_layers[0]));               p['b1'] = w((1, hidden_layers[0]))
    p['w2'] = w((hidden_layers[0], hidden_layers[1])); p['b2'] = w((1, hidden_layers[1]))
    p['wo'] = w((hidden_layers[1], output_size));      p['bo'] = w((1, output_size))
    return p


# ---------------------------------------------------------------------------
# Pure-JAX reference for correctness checking (same packed weights).
# ---------------------------------------------------------------------------
def reference_forward(x_ncl, params, K):
    x = jnp.transpose(x_ncl, (0, 2, 1))
    for wk, bk in [('cw1', 'cb1'), ('cw2', 'cb2'), ('cw3', 'cb3')]:
        w_flat = params[wk]
        c_out = w_flat.shape[1]
        c_in = w_flat.shape[0] // K
        w3 = w_flat.reshape(K, c_in, c_out)
        pad = (K - 1) // 2
        L = x.shape[1]
        xp = jnp.pad(x, ((0, 0), (pad, pad), (0, 0)))
        x = sum(jnp.einsum('blc,co->blo', xp[:, k:k + L, :], w3[k])
                for k in range(K)) + params[bk]
    H = params['w_hh'].shape[0]
    B, L, _ = x.shape

    def step(h, xt):
        gi = xt @ params['w_ih'] + params['b_ih']
        gh = h @ params['w_hh'] + params['b_hh']
        r = jax.nn.sigmoid(gi[:, :H] + gh[:, :H])
        z = jax.nn.sigmoid(gi[:, H:2 * H] + gh[:, H:2 * H])
        n = jnp.tanh(gi[:, 2 * H:] + r * gh[:, 2 * H:])
        h_new = (1.0 - z) * n + z * h
        return h_new, h_new

    _, outs = jax.lax.scan(step, jnp.zeros((B, H), jnp.float32),
                           jnp.transpose(x, (1, 0, 2)))
    rnn_out = jnp.transpose(outs, (1, 0, 2))
    h = jnp.maximum(rnn_out, 0.0)
    h = jnp.maximum(h @ params['w1'] + params['b1'], 0.0)
    h = jnp.maximum(h @ params['w2'] + params['b2'], 0.0)
    return h @ params['wo'] + params['bo']


if __name__ == "__main__":
    B, input_size, seq_len = 2, 8, 16
    hidden_size, output_size = 32, 4
    conv_layers = [16, 16, 16]
    hidden_layers = [32, 32]
    kernel_size = 5

    key = jax.random.PRNGKey(0)
    pkey, xkey = jax.random.split(key)
    params = init_params(pkey, input_size, hidden_size, output_size,
                         kernel_size, conv_layers, hidden_layers)
    x = jax.random.normal(xkey, (B, input_size, seq_len), jnp.float32)

    out = jax.block_until_ready(seq2seq_cnn_rnn_forward(x, params))
    assert out.shape == (B, seq_len, output_size), out.shape

    ref = reference_forward(x, params, kernel_size)
    assert jnp.allclose(out, ref, rtol=1e-3, atol=1e-3), \
        float(jnp.max(jnp.abs(out - ref)))
    print("KERNEL_OK")
</pallas_src>

<mosaic_0001>
module attributes {stable_mosaic.version = 11 : i64} {
  func.func @fused_kernel(%arg0: i32, %arg1: memref<1x16x8xf32, #tpu.memory_space<vmem>>, %arg2: memref<40x16xf32, #tpu.memory_space<vmem>>, %arg3: memref<1x16xf32, #tpu.memory_space<vmem>>, %arg4: memref<80x16xf32, #tpu.memory_space<vmem>>, %arg5: memref<1x16xf32, #tpu.memory_space<vmem>>, %arg6: memref<80x16xf32, #tpu.memory_space<vmem>>, %arg7: memref<1x16xf32, #tpu.memory_space<vmem>>, %arg8: memref<16x96xf32, #tpu.memory_space<vmem>>, %arg9: memref<32x96xf32, #tpu.memory_space<vmem>>, %arg10: memref<1x96xf32, #tpu.memory_space<vmem>>, %arg11: memref<1x96xf32, #tpu.memory_space<vmem>>, %arg12: memref<32x32xf32, #tpu.memory_space<vmem>>, %arg13: memref<1x32xf32, #tpu.memory_space<vmem>>, %arg14: memref<32x32xf32, #tpu.memory_space<vmem>>, %arg15: memref<1x32xf32, #tpu.memory_space<vmem>>, %arg16: memref<32x4xf32, #tpu.memory_space<vmem>>, %arg17: memref<1x4xf32, #tpu.memory_space<vmem>>, %arg18: memref<1x16x4xf32, #tpu.memory_space<vmem>>, %arg19: memref<20x16xf32, #tpu.memory_space<vmem>>, %arg20: memref<16x32xf32, #tpu.memory_space<vmem>>) attributes {dimension_semantics = [#tpu.dimension_semantics<parallel>], iteration_bounds = array<i64: 2>, scalar_prefetch = 0 : i64, scratch_operands = 2 : i64, tpu.core_type = #tpu.core_type<tc>, window_params = [{transform_indices = @transform_0, window_bounds = array<i64: 1, 16, 8>}, {pipeline_mode = #tpu.pipeline_mode<synchronous>, transform_indices = @transform_1, window_bounds = array<i64: 40, 16>}, {pipeline_mode = #tpu.pipeline_mode<synchronous>, transform_indices = @transform_2, window_bounds = array<i64: 1, 16>}, {pipeline_mode = #tpu.pipeline_mode<synchronous>, transform_indices = @transform_3, window_bounds = array<i64: 80, 16>}, {pipeline_mode = #tpu.pipeline_mode<synchronous>, transform_indices = @transform_4, window_bounds = array<i64: 1, 16>}, {pipeline_mode = #tpu.pipeline_mode<synchronous>, transform_indices = @transform_5, window_bounds = array<i64: 80, 16>}, {pipeline_mode = #tpu.pipeline_mode<synchronous>, transform_indices = @transform_6, window_bounds = array<i64: 1, 16>}, {pipeline_mode = #tpu.pipeline_mode<synchronous>, transform_indices = @transform_7, window_bounds = array<i64: 16, 96>}, {pipeline_mode = #tpu.pipeline_mode<synchronous>, transform_indices = @transform_8, window_bounds = array<i64: 32, 96>}, {pipeline_mode = #tpu.pipeline_mode<synchronous>, transform_indices = @transform_9, window_bounds = array<i64: 1, 96>}, {pipeline_mode = #tpu.pipeline_mode<synchronous>, transform_indices = @transform_10, window_bounds = array<i64: 1, 96>}, {pipeline_mode = #tpu.pipeline_mode<synchronous>, transform_indices = @transform_11, window_bounds = array<i64: 32, 32>}, {pipeline_mode = #tpu.pipeline_mode<synchronous>, transform_indices = @transform_12, window_bounds = array<i64: 1, 32>}, {pipeline_mode = #tpu.pipeline_mode<synchronous>, transform_indices = @transform_13, window_bounds = array<i64: 32, 32>}, {pipeline_mode = #tpu.pipeline_mode<synchronous>, transform_indices = @transform_14, window_bounds = array<i64: 1, 32>}, {pipeline_mode = #tpu.pipeline_mode<synchronous>, transform_indices = @transform_15, window_bounds = array<i64: 32, 4>}, {pipeline_mode = #tpu.pipeline_mode<synchronous>, transform_indices = @transform_16, window_bounds = array<i64: 1, 4>}, {transform_indices = @transform_17, window_bounds = array<i64: 1, 16, 4>}]} {
    %cst = arith.constant 0.000000e+00 : f32
    %0 = vector.broadcast %cst : f32 to vector<20x16xf32>
    %c0 = arith.constant 0 : index
    %c0_0 = arith.constant 0 : index
    %1 = vector.load %arg19[%c0, %c0_0] : memref<20x16xf32, #tpu.memory_space<vmem>>, vector<20x16xf32>
    tpu.vector_store %arg19[%c0, %c0_0], %0 {strides = array<i32>} : memref<20x16xf32, #tpu.memory_space<vmem>>, vector<20x16xf32>,
    %c0_1 = arith.constant 0 : index
    %c0_2 = arith.constant 0 : index
    %c0_3 = arith.constant 0 : index
    %2 = vector.load %arg1[%c0_1, %c0_2, %c0_3] : memref<1x16x8xf32, #tpu.memory_space<vmem>>, vector<1x16x8xf32>
    %3 = vector.shape_cast %2 : vector<1x16x8xf32> to vector<16x8xf32>
    %c2 = arith.constant 2 : index
    %c0_4 = arith.constant 0 : index
    %4 = vector.load %arg19[%c2, %c0_4] : memref<20x16xf32, #tpu.memory_space<vmem>>, vector<16x8xf32>
    tpu.vector_store %arg19[%c2, %c0_4], %3 {strides = array<i32>} : memref<20x16xf32, #tpu.memory_space<vmem>>, vector<16x8xf32>,
    %c0_5 = arith.constant 0 : index
    %c0_6 = arith.constant 0 : index
    %5 = vector.load %arg19[%c0_5, %c0_6] : memref<20x16xf32, #tpu.memory_space<vmem>>, vector<16x8xf32>
    %c1 = arith.constant 1 : index
    %c0_7 = arith.constant 0 : index
    %6 = vector.load %arg19[%c1, %c0_7] : memref<20x16xf32, #tpu.memory_space<vmem>>, vector<16x8xf32>
    %c2_8 = arith.constant 2 : index
    %c0_9 = arith.constant 0 : index
    %7 = vector.load %arg19[%c2_8, %c0_9] : memref<20x16xf32, #tpu.memory_space<vmem>>, vector<16x8xf32>
    %c3 = arith.constant 3 : index
    %c0_10 = arith.constant 0 : index
    %8 = vector.load %arg19[%c3, %c0_10] : memref<20x16xf32, #tpu.memory_space<vmem>>, vector<16x8xf32>
    %c4 = arith.constant 4 : index
    %c0_11 = arith.constant 0 : index
    %9 = vector.load %arg19[%c4, %c0_11] : memref<20x16xf32, #tpu.memory_space<vmem>>, vector<16x8xf32>
    %10 = tpu.concatenate %5, %6, %7, %8, %9 in 1 : vector<16x8xf32>, vector<16x8xf32>, vector<16x8xf32>, vector<16x8xf32>, vector<16x8xf32> -> vector<16x40xf32>
    %c0_12 = arith.constant 0 : index
    %c0_13 = arith.constant 0 : index
    %11 = vector.load %arg2[%c0_12, %c0_13] : memref<40x16xf32, #tpu.memory_space<vmem>>, vector<40x16xf32>
    %cst_14 = arith.constant dense<0.000000e+00> : vector<16x16xf32>
    %12 = tpu.matmul %10, %11, %cst_14 {dimension_numbers = #tpu.dot_dimension_numbers<[1], [0], [0], [1], [0, 0, 1, 1], [], []>} : vector<16x40xf32>, vector<40x16xf32>, vector<16x16xf32> -> vector<16x16xf32>
    %c0_15 = arith.constant 0 : index
    %c0_16 = arith.constant 0 : index
    %13 = vector.load %arg3[%c0_15, %c0_16] : memref<1x16xf32, #tpu.memory_space<vmem>>, vector<1x16xf32>
    %14 = vector.broadcast %13 : vector<1x16xf32> to vector<16x16xf32>
    %15 = arith.addf %12, %14 : vector<16x16xf32>
    %c2_17 = arith.constant 2 : index
    %c0_18 = arith.constant 0 : index
    %16 = vector.load %arg19[%c2_17, %c0_18] : memref<20x16xf32, #tpu.memory_space<vmem>>, vector<16x16xf32>
    tpu.vector_store %arg19[%c2_17, %c0_18], %15 {strides = array<i32>} : memref<20x16xf32, #tpu.memory_space<vmem>>, vector<16x16xf32>,
    %c0_19 = arith.constant 0 : index
    %c0_20 = arith.constant 0 : index
    %17 = vector.load %arg19[%c0_19, %c0_20] : memref<20x16xf32, #tpu.memory_space<vmem>>, vector<16x16xf32>
    %c1_21 = arith.constant 1 : index
    %c0_22 = arith.constant 0 : index
    %18 = vector.load %arg19[%c1_21, %c0_22] : memref<20x16xf32, #tpu.memory_space<vmem>>, vector<16x16xf32>
    %c2_23 = arith.constant 2 : index
    %c0_24 = arith.constant 0 : index
    %19 = vector.load %arg19[%c2_23, %c0_24] : memref<20x16xf32, #tpu.memory_space<vmem>>, vector<16x16xf32>
    %c3_25 = arith.constant 3 : index
    %c0_26 = arith.constant 0 : index
    %20 = vector.load %arg19[%c3_25, %c0_26] : memref<20x16xf32, #tpu.memory_space<vmem>>, vector<16x16xf32>
    %c4_27 = arith.constant 4 : index
    %c0_28 = arith.constant 0 : index
    %21 = vector.load %arg19[%c4_27, %c0_28] : memref<20x16xf32, #tpu.memory_space<vmem>>, vector<16x16xf32>
    %22 = tpu.concatenate %17, %18, %19, %20, %21 in 1 : vector<16x16xf32>, vector<16x16xf32>, vector<16x16xf32>, vector<16x16xf32>, vector<16x16xf32> -> vector<16x80xf32>
    %c0_29 = arith.constant 0 : index
    %c0_30 = arith.constant 0 : index
    %23 = vector.load %arg4[%c0_29, %c0_30] : memref<80x16xf32, #tpu.memory_space<vmem>>, vector<80x16xf32>
    %cst_31 = arith.constant dense<0.000000e+00> : vector<16x16xf32>
    %24 = tpu.matmul %22, %23, %cst_31 {dimension_numbers = #tpu.dot_dimension_numbers<[1], [0], [0], [1], [0, 0, 1, 1], [], []>} : vector<16x80xf32>, vector<80x16xf32>, vector<16x16xf32> -> vector<16x16xf32>
    %c0_32 = arith.constant 0 : index
    %c0_33 = arith.constant 0 : index
    %25 = vector.load %arg5[%c0_32, %c0_33] : memref<1x16xf32, #tpu.memory_space<vmem>>, vector<1x16xf32>
    %26 = vector.broadcast %25 : vector<1x16xf32> to vector<16x16xf32>
    %27 = arith.addf %24, %26 : vector<16x16xf32>
    %c2_34 = arith.constant 2 : index
    %c0_35 = arith.constant 0 : index
    %28 = vector.load %arg19[%c2_34, %c0_35] : memref<20x16xf32, #tpu.memory_space<vmem>>, vector<16x16xf32>
    tpu.vector_store %arg19[%c2_34, %c0_35], %27 {strides = array<i32>} : memref<20x16xf32, #tpu.memory_space<vmem>>, vector<16x16xf32>,
    %c0_36 = arith.constant 0 : index
    %c0_37 = arith.constant 0 : index
    %29 = vector.load %arg19[%c0_36, %c0_37] : memref<20x16xf32, #tpu.memory_space<vmem>>, vector<16x16xf32>
    %c1_38 = arith.constant 1 : index
    %c0_39 = arith.constant 0 : index
    %30 = vector.load %arg19[%c1_38, %c0_39] : memref<20x16xf32, #tpu.memory_space<vmem>>, vector<16x16xf32>
    %c2_40 = arith.constant 2 : index
    %c0_41 = arith.constant 0 : index
    %31 = vector.load %arg19[%c2_40, %c0_41] : memref<20x16xf32, #tpu.memory_space<vmem>>, vector<16x16xf32>
    %c3_42 = arith.constant 3 : index
    %c0_43 = arith.constant 0 : index
    %32 = vector.load %arg19[%c3_42, %c0_43] : memref<20x16xf32, #tpu.memory_space<vmem>>, vector<16x16xf32>
    %c4_44 = arith.constant 4 : index
    %c0_45 = arith.constant 0 : index
    %33 = vector.load %arg19[%c4_44, %c0_45] : memref<20x16xf32, #tpu.memory_space<vmem>>, vector<16x16xf32>
    %34 = tpu.concatenate %29, %30, %31, %32, %33 in 1 : vector<16x16xf32>, vector<16x16xf32>, vector<16x16xf32>, vector<16x16xf32>, vector<16x16xf32> -> vector<16x80xf32>
    %c0_46 = arith.constant 0 : index
    %c0_47 = arith.constant 0 : index
    %35 = vector.load %arg6[%c0_46, %c0_47] : memref<80x16xf32, #tpu.memory_space<vmem>>, vector<80x16xf32>
    %cst_48 = arith.constant dense<0.000000e+00> : vector<16x16xf32>
    %36 = tpu.matmul %34, %35, %cst_48 {dimension_numbers = #tpu.dot_dimension_numbers<[1], [0], [0], [1], [0, 0, 1, 1], [], []>} : vector<16x80xf32>, vector<80x16xf32>, vector<16x16xf32> -> vector<16x16xf32>
    %c0_49 = arith.constant 0 : index
    %c0_50 = arith.constant 0 : index
    %37 = vector.load %arg7[%c0_49, %c0_50] : memref<1x16xf32, #tpu.memory_space<vmem>>, vector<1x16xf32>
    %38 = vector.broadcast %37 : vector<1x16xf32> to vector<16x16xf32>
    %39 = arith.addf %36, %38 : vector<16x16xf32>
    %c0_51 = arith.constant 0 : index
    %c0_52 = arith.constant 0 : index
    %40 = vector.load %arg8[%c0_51, %c0_52] : memref<16x96xf32, #tpu.memory_space<vmem>>, vector<16x96xf32>
    %cst_53 = arith.constant dense<0.000000e+00> : vector<16x96xf32>
    %41 = tpu.matmul %39, %40, %cst_53 {dimension_numbers = #tpu.dot_dimension_numbers<[1], [0], [0], [1], [0, 0, 1, 1], [], []>} : vector<16x16xf32>, vector<16x96xf32>, vector<16x96xf32> -> vector<16x96xf32>
    %c0_54 = arith.constant 0 : index
    %c0_55 = arith.constant 0 : index
    %42 = vector.load %arg10[%c0_54, %c0_55] : memref<1x96xf32, #tpu.memory_space<vmem>>, vector<1x96xf32>
    %43 = vector.broadcast %42 : vector<1x96xf32> to vector<16x96xf32>
    %44 = arith.addf %41, %43 : vector<16x96xf32>
    %c0_56 = arith.constant 0 : index
    %c0_57 = arith.constant 0 : index
    %45 = vector.load %arg9[%c0_56, %c0_57] : memref<32x96xf32, #tpu.memory_space<vmem>>, vector<32x96xf32>
    %c0_58 = arith.constant 0 : index
    %c0_59 = arith.constant 0 : index
    %46 = vector.load %arg11[%c0_58, %c0_59] : memref<1x96xf32, #tpu.memory_space<vmem>>, vector<1x96xf32>
    %cst_60 = arith.constant 0.000000e+00 : f32
    %47 = vector.broadcast %cst_60 : f32 to vector<1x32xf32>
    %cst_61 = arith.constant dense<0.000000e+00> : vector<1x96xf32>
    %48 = tpu.matmul %47, %45, %cst_61 {dimension_numbers = #tpu.dot_dimension_numbers<[1], [0], [0], [1], [0, 0, 1, 1], [], []>} : vector<1x32xf32>, vector<32x96xf32>, vector<1x96xf32> -> vector<1x96xf32>
    %49 = arith.addf %48, %46 : vector<1x96xf32>
    %50 = vector.extract_strided_slice %44 {offsets = [0, 0], sizes = [1, 96], strides = [1, 1]} : vector<16x96xf32> to vector<1x96xf32>
    %51 = vector.extract_strided_slice %50 {offsets = [0, 0], sizes = [1, 32], strides = [1, 1]} : vector<1x96xf32> to vector<1x32xf32>
    %52 = vector.extract_strided_slice %49 {offsets = [0, 0], sizes = [1, 32], strides = [1, 1]} : vector<1x96xf32> to vector<1x32xf32>
    %53 = arith.addf %51, %52 : vector<1x32xf32>
    %54 = arith.negf %53 : vector<1x32xf32>
    %55 = math.exp %54 : vector<1x32xf32>
    %cst_62 = arith.constant 1.000000e+00 : f32
    %56 = vector.broadcast %cst_62 : f32 to vector<1x32xf32>
    %57 = arith.addf %56, %55 : vector<1x32xf32>
    %58 = arith.divf %56, %57 : vector<1x32xf32>
    %59 = vector.extract_strided_slice %50 {offsets = [0, 32], sizes = [1, 32], strides = [1, 1]} : vector<1x96xf32> to vector<1x32xf32>
    %60 = vector.extract_strided_slice %49 {offsets = [0, 32], sizes = [1, 32], strides = [1, 1]} : vector<1x96xf32> to vector<1x32xf32>
    %61 = arith.addf %59, %60 : vector<1x32xf32>
    %62 = arith.negf %61 : vector<1x32xf32>
    %63 = math.exp %62 : vector<1x32xf32>
    %cst_63 = arith.constant 1.000000e+00 : f32
    %64 = vector.broadcast %cst_63 : f32 to vector<1x32xf32>
    %65 = arith.addf %64, %63 : vector<1x32xf32>
    %66 = arith.divf %64, %65 : vector<1x32xf32>
    %67 = vector.extract_strided_slice %50 {offsets = [0, 64], sizes = [1, 32], strides = [1, 1]} : vector<1x96xf32> to vector<1x32xf32>
    %68 = vector.extract_strided_slice %49 {offsets = [0, 64], sizes = [1, 32], strides = [1, 1]} : vector<1x96xf32> to vector<1x32xf32>
    %69 = arith.mulf %58, %68 : vector<1x32xf32>
    %70 = arith.addf %67, %69 : vector<1x32xf32>
    %71 = math.tanh %70 : vector<1x32xf32>
    %cst_64 = arith.constant 1.000000e+00 : f32
    %72 = vector.broadcast %cst_64 : f32 to vector<1x32xf32>
    %73 = arith.subf %72, %66 : vector<1x32xf32>
    %74 = arith.mulf %73, %71 : vector<1x32xf32>
    %75 = arith.mulf %66, %47 : vector<1x32xf32>
    %76 = arith.addf %74, %75 : vector<1x32xf32>
    %c0_65 = arith.constant 0 : index
    %c0_66 = arith.constant 0 : index
    %77 = vector.load %arg20[%c0_65, %c0_66] : memref<16x32xf32, #tpu.memory_space<vmem>>, vector<1x32xf32>
    tpu.vector_store %arg20[%c0_65, %c0_66], %76 {strides = array<i32>} : memref<16x32xf32, #tpu.memory_space<vmem>>, vector<1x32xf32>,
    %cst_67 = arith.constant dense<0.000000e+00> : vector<1x96xf32>
    %78 = tpu.matmul %76, %45, %cst_67 {dimension_numbers = #tpu.dot_dimension_numbers<[1], [0], [0], [1], [0, 0, 1, 1], [], []>} : vector<1x32xf32>, vector<32x96xf32>, vector<1x96xf32> -> vector<1x96xf32>
    %79 = arith.addf %78, %46 : vector<1x96xf32>
    %80 = vector.extract_strided_slice %44 {offsets = [1, 0], sizes = [1, 96], strides = [1, 1]} : vector<16x96xf32> to vector<1x96xf32>
    %81 = vector.extract_strided_slice %80 {offsets = [0, 0], sizes = [1, 32], strides = [1, 1]} : vector<1x96xf32> to vector<1x32xf32>
    %82 = vector.extract_strided_slice %79 {offsets = [0, 0], sizes = [1, 32], strides = [1, 1]} : vector<1x96xf32> to vector<1x32xf32>
    %83 = arith.addf %81, %82 : vector<1x32xf32>
    %84 = arith.negf %83 : vector<1x32xf32>
    %85 = math.exp %84 : vector<1x32xf32>
    %cst_68 = arith.constant 1.000000e+00 : f32
    %86 = vector.broadcast %cst_68 : f32 to vector<1x32xf32>
    %87 = arith.addf %86, %85 : vector<1x32xf32>
    %88 = arith.divf %86, %87 : vector<1x32xf32>
    %89 = vector.extract_strided_slice %80 {offsets = [0, 32], sizes = [1, 32], strides = [1, 1]} : vector<1x96xf32> to vector<1x32xf32>
    %90 = vector.extract_strided_slice %79 {offsets = [0, 32], sizes = [1, 32], strides = [1, 1]} : vector<1x96xf32> to vector<1x32xf32>
    %91 = arith.addf %89, %90 : vector<1x32xf32>
    %92 = arith.negf %91 : vector<1x32xf32>
    %93 = math.exp %92 : vector<1x32xf32>
    %cst_69 = arith.constant 1.000000e+00 : f32
    %94 = vector.broadcast %cst_69 : f32 to vector<1x32xf32>
    %95 = arith.addf %94, %93 : vector<1x32xf32>
    %96 = arith.divf %94, %95 : vector<1x32xf32>
    %97 = vector.extract_strided_slice %80 {offsets = [0, 64], sizes = [1, 32], strides = [1, 1]} : vector<1x96xf32> to vector<1x32xf32>
    %98 = vector.extract_strided_slice %79 {offsets = [0, 64], sizes = [1, 32], strides = [1, 1]} : vector<1x96xf32> to vector<1x32xf32>
    %99 = arith.mulf %88, %98 : vector<1x32xf32>
    %100 = arith.addf %97, %99 : vector<1x32xf32>
    %101 = math.tanh %100 : vector<1x32xf32>
    %cst_70 = arith.constant 1.000000e+00 : f32
    %102 = vector.broadcast %cst_70 : f32 to vector<1x32xf32>
    %103 = arith.subf %102, %96 : vector<1x32xf32>
    %104 = arith.mulf %103, %101 : vector<1x32xf32>
    %105 = arith.mulf %96, %76 : vector<1x32xf32>
    %106 = arith.addf %104, %105 : vector<1x32xf32>
    %c1_71 = arith.constant 1 : index
    %c0_72 = arith.constant 0 : index
    %107 = vector.load %arg20[%c1_71, %c0_72] : memref<16x32xf32, #tpu.memory_space<vmem>>, vector<1x32xf32>
    tpu.vector_store %arg20[%c1_71, %c0_72], %106 {strides = array<i32>} : memref<16x32xf32, #tpu.memory_space<vmem>>, vector<1x32xf32>,
    %cst_73 = arith.constant dense<0.000000e+00> : vector<1x96xf32>
    %108 = tpu.matmul %106, %45, %cst_73 {dimension_numbers = #tpu.dot_dimension_numbers<[1], [0], [0], [1], [0, 0, 1, 1], [], []>} : vector<1x32xf32>, vector<32x96xf32>, vector<1x96xf32> -> vector<1x96xf32>
    %109 = arith.addf %108, %46 : vector<1x96xf32>
    %110 = vector.extract_strided_slice %44 {offsets = [2, 0], sizes = [1, 96], strides = [1, 1]} : vector<16x96xf32> to vector<1x96xf32>
    %111 = vector.extract_strided_slice %110 {offsets = [0, 0], sizes = [1, 32], strides = [1, 1]} : vector<1x96xf32> to vector<1x32xf32>
    %112 = vector.extract_strided_slice %109 {offsets = [0, 0], sizes = [1, 32], strides = [1, 1]} : vector<1x96xf32> to vector<1x32xf32>
    %113 = arith.addf %111, %112 : vector<1x32xf32>
    %114 = arith.negf %113 : vector<1x32xf32>
    %115 = math.exp %114 : vector<1x32xf32>
    %cst_74 = arith.constant 1.000000e+00 : f32
    %116 = vector.broadcast %cst_74 : f32 to vector<1x32xf32>
    %117 = arith.addf %116, %115 : vector<1x32xf32>
    %118 = arith.divf %116, %117 : vector<1x32xf32>
    %119 = vector.extract_strided_slice %110 {offsets = [0, 32], sizes = [1, 32], strides = [1, 1]} : vector<1x96xf32> to vector<1x32xf32>
    %120 = vector.extract_strided_slice %109 {offsets = [0, 32], sizes = [1, 32], strides = [1, 1]} : vector<1x96xf32> to vector<1x32xf32>
    %121 = arith.addf %119, %120 : vector<1x32xf32>
    %122 = arith.negf %121 : vector<1x32xf32>
    %123 = math.exp %122 : vector<1x32xf32>
    %cst_75 = arith.constant 1.000000e+00 : f32
    %124 = vector.broadcast %cst_75 : f32 to vector<1x32xf32>
    %125 = arith.addf %124, %123 : vector<1x32xf32>
    %126 = arith.divf %124, %125 : vector<1x32xf32>
    %127 = vector.extract_strided_slice %110 {offsets = [0, 64], sizes = [1, 32], strides = [1, 1]} : vector<1x96xf32> to vector<1x32xf32>
    %128 = vector.extract_strided_slice %109 {offsets = [0, 64], sizes = [1, 32], strides = [1, 1]} : vector<1x96xf32> to vector<1x32xf32>
    %129 = arith.mulf %118, %128 : vector<1x32xf32>
    %130 = arith.addf %127, %129 : vector<1x32xf32>
    %131 = math.tanh %130 : vector<1x32xf32>
    %cst_76 = arith.constant 1.000000e+00 : f32
    %132 = vector.broadcast %cst_76 : f32 to vector<1x32xf32>
    %133 = arith.subf %132, %126 : vector<1x32xf32>
    %134 = arith.mulf %133, %131 : vector<1x32xf32>
    %135 = arith.mulf %126, %106 : vector<1x32xf32>
    %136 = arith.addf %134, %135 : vector<1x32xf32>
    %c2_77 = arith.constant 2 : index
    %c0_78 = arith.constant 0 : index
    %137 = vector.load %arg20[%c2_77, %c0_78] : memref<16x32xf32, #tpu.memory_space<vmem>>, vector<1x32xf32>
    tpu.vector_store %arg20[%c2_77, %c0_78], %136 {strides = array<i32>} : memref<16x32xf32, #tpu.memory_space<vmem>>, vector<1x32xf32>,
    %cst_79 = arith.constant dense<0.000000e+00> : vector<1x96xf32>
    %138 = tpu.matmul %136, %45, %cst_79 {dimension_numbers = #tpu.dot_dimension_numbers<[1], [0], [0], [1], [0, 0, 1, 1], [], []>} : vector<1x32xf32>, vector<32x96xf32>, vector<1x96xf32> -> vector<1x96xf32>
    %139 = arith.addf %138, %46 : vector<1x96xf32>
    %140 = vector.extract_strided_slice %44 {offsets = [3, 0], sizes = [1, 96], strides = [1, 1]} : vector<16x96xf32> to vector<1x96xf32>
    %141 = vector.extract_strided_slice %140 {offsets = [0, 0], sizes = [1, 32], strides = [1, 1]} : vector<1x96xf32> to vector<1x32xf32>
    %142 = vector.extract_strided_slice %139 {offsets = [0, 0], sizes = [1, 32], strides = [1, 1]} : vector<1x96xf32> to vector<1x32xf32>
    %143 = arith.addf %141, %142 : vector<1x32xf32>
    %144 = arith.negf %143 : vector<1x32xf32>
    %145 = math.exp %144 : vector<1x32xf32>
    %cst_80 = arith.constant 1.000000e+00 : f32
    %146 = vector.broadcast %cst_80 : f32 to vector<1x32xf32>
    %147 = arith.addf %146, %145 : vector<1x32xf32>
    %148 = arith.divf %146, %147 : vector<1x32xf32>
    %149 = vector.extract_strided_slice %140 {offsets = [0, 32], sizes = [1, 32], strides = [1, 1]} : vector<1x96xf32> to vector<1x32xf32>
    %150 = vector.extract_strided_slice %139 {offsets = [0, 32], sizes = [1, 32], strides = [1, 1]} : vector<1x96xf32> to vector<1x32xf32>
    %151 = arith.addf %149, %150 : vector<1x32xf32>
    %152 = arith.negf %151 : vector<1x32xf32>
    %153 = math.exp %152 : vector<1x32xf32>
    %cst_81 = arith.constant 1.000000e+00 : f32
    %154 = vector.broadcast %cst_81 : f32 to vector<1x32xf32>
    %155 = arith.addf %154, %153 : vector<1x32xf32>
    %156 = arith.divf %154, %155 : vector<1x32xf32>
    %157 = vector.extract_strided_slice %140 {offsets = [0, 64], sizes = [1, 32], strides = [1, 1]} : vector<1x96xf32> to vector<1x32xf32>
    %158 = vector.extract_strided_slice %139 {offsets = [0, 64], sizes = [1, 32], strides = [1, 1]} : vector<1x96xf32> to vector<1x32xf32>
    %159 = arith.mulf %148, %158 : vector<1x32xf32>
    %160 = arith.addf %157, %159 : vector<1x32xf32>
    %161 = math.tanh %160 : vector<1x32xf32>
    %cst_82 = arith.constant 1.000000e+00 : f32
    %162 = vector.broadcast %cst_82 : f32 to vector<1x32xf32>
    %163 = arith.subf %162, %156 : vector<1x32xf32>
    %164 = arith.mulf %163, %161 : vector<1x32xf32>
    %165 = arith.mulf %156, %136 : vector<1x32xf32>
    %166 = arith.addf %164, %165 : vector<1x32xf32>
    %c3_83 = arith.constant 3 : index
    %c0_84 = arith.constant 0 : index
    %167 = vector.load %arg20[%c3_83, %c0_84] : memref<16x32xf32, #tpu.memory_space<vmem>>, vector<1x32xf32>
    tpu.vector_store %arg20[%c3_83, %c0_84], %166 {strides = array<i32>} : memref<16x32xf32, #tpu.memory_space<vmem>>, vector<1x32xf32>,
    %cst_85 = arith.constant dense<0.000000e+00> : vector<1x96xf32>
    %168 = tpu.matmul %166, %45, %cst_85 {dimension_numbers = #tpu.dot_dimension_numbers<[1], [0], [0], [1], [0, 0, 1, 1], [], []>} : vector<1x32xf32>, vector<32x96xf32>, vector<1x96xf32> -> vector<1x96xf32>
    %169 = arith.addf %168, %46 : vector<1x96xf32>
    %170 = vector.extract_strided_slice %44 {offsets = [4, 0], sizes = [1, 96], strides = [1, 1]} : vector<16x96xf32> to vector<1x96xf32>
    %171 = vector.extract_strided_slice %170 {offsets = [0, 0], sizes = [1, 32], strides = [1, 1]} : vector<1x96xf32> to vector<1x32xf32>
    %172 = vector.extract_strided_slice %169 {offsets = [0, 0], sizes = [1, 32], strides = [1, 1]} : vector<1x96xf32> to vector<1x32xf32>
    %173 = arith.addf %171, %172 : vector<1x32xf32>
    %174 = arith.negf %173 : vector<1x32xf32>
    %175 = math.exp %174 : vector<1x32xf32>
    %cst_86 = arith.constant 1.000000e+00 : f32
    %176 = vector.broadcast %cst_86 : f32 to vector<1x32xf32>
    %177 = arith.addf %176, %175 : vector<1x32xf32>
    %178 = arith.divf %176, %177 : vector<1x32xf32>
    %179 = vector.extract_strided_slice %170 {offsets = [0, 32], sizes = [1, 32], strides = [1, 1]} : vector<1x96xf32> to vector<1x32xf32>
    %180 = vector.extract_strided_slice %169 {offsets = [0, 32], sizes = [1, 32], strides = [1, 1]} : vector<1x96xf32> to vector<1x32xf32>
    %181 = arith.addf %179, %180 : vector<1x32xf32>
    %182 = arith.negf %181 : vector<1x32xf32>
    %183 = math.exp %182 : vector<1x32xf32>
    %cst_87 = arith.constant 1.000000e+00 : f32
    %184 = vector.broadcast %cst_87 : f32 to vector<1x32xf32>
    %185 = arith.addf %184, %183 : vector<1x32xf32>
    %186 = arith.divf %184, %185 : vector<1x32xf32>
    %187 = vector.extract_strided_slice %170 {offsets = [0, 64], sizes = [1, 32], strides = [1, 1]} : vector<1x96xf32> to vector<1x32xf32>
    %188 = vector.extract_strided_slice %169 {offsets = [0, 64], sizes = [1, 32], strides = [1, 1]} : vector<1x96xf32> to vector<1x32xf32>
    %189 = arith.mulf %178, %188 : vector<1x32xf32>
    %190 = arith.addf %187, %189 : vector<1x32xf32>
    %191 = math.tanh %190 : vector<1x32xf32>
    %cst_88 = arith.constant 1.000000e+00 : f32
    %192 = vector.broadcast %cst_88 : f32 to vector<1x32xf32>
    %193 = arith.subf %192, %186 : vector<1x32xf32>
    %194 = arith.mulf %193, %191 : vector<1x32xf32>
    %195 = arith.mulf %186, %166 : vector<1x32xf32>
    %196 = arith.addf %194, %195 : vector<1x32xf32>
    %c4_89 = arith.constant 4 : index
    %c0_90 = arith.constant 0 : index
    %197 = vector.load %arg20[%c4_89, %c0_90] : memref<16x32xf32, #tpu.memory_space<vmem>>, vector<1x32xf32>
    tpu.vector_store %arg20[%c4_89, %c0_90], %196 {strides = array<i32>} : memref<16x32xf32, #tpu.memory_space<vmem>>, vector<1x32xf32>,
    %cst_91 = arith.constant dense<0.000000e+00> : vector<1x96xf32>
    %198 = tpu.matmul %196, %45, %cst_91 {dimension_numbers = #tpu.dot_dimension_numbers<[1], [0], [0], [1], [0, 0, 1, 1], [], []>} : vector<1x32xf32>, vector<32x96xf32>, vector<1x96xf32> -> vector<1x96xf32>
    %199 = arith.addf %198, %46 : vector<1x96xf32>
    %200 = vector.extract_strided_slice %44 {offsets = [5, 0], sizes = [1, 96], strides = [1, 1]} : vector<16x96xf32> to vector<1x96xf32>
    %201 = vector.extract_strided_slice %200 {offsets = [0, 0], sizes = [1, 32], strides = [1, 1]} : vector<1x96xf32> to vector<1x32xf32>
    %202 = vector.extract_strided_slice %199 {offsets = [0, 0], sizes = [1, 32], strides = [1, 1]} : vector<1x96xf32> to vector<1x32xf32>
    %203 = arith.addf %201, %202 : vector<1x32xf32>
    %204 = arith.negf %203 : vector<1x32xf32>
    %205 = math.exp %204 : vector<1x32xf32>
    %cst_92 = arith.constant 1.000000e+00 : f32
    %206 = vector.broadcast %cst_92 : f32 to vector<1x32xf32>
    %207 = arith.addf %206, %205 : vector<1x32xf32>
    %208 = arith.divf %206, %207 : vector<1x32xf32>
    %209 = vector.extract_strided_slice %200 {offsets = [0, 32], sizes = [1, 32], strides = [1, 1]} : vector<1x96xf32> to vector<1x32xf32>
    %210 = vector.extract_strided_slice %199 {offsets = [0, 32], sizes = [1, 32], strides = [1, 1]} : vector<1x96xf32> to vector<1x32xf32>
    %211 = arith.addf %209, %210 : vector<1x32xf32>
    %212 = arith.negf %211 : vector<1x32xf32>
    %213 = math.exp %212 : vector<1x32xf32>
    %cst_93 = arith.constant 1.000000e+00 : f32
    %214 = vector.broadcast %cst_93 : f32 to vector<1x32xf32>
    %215 = arith.addf %214, %213 : vector<1x32xf32>
    %216 = arith.divf %214, %215 : vector<1x32xf32>
    %217 = vector.extract_strided_slice %200 {offsets = [0, 64], sizes = [1, 32], strides = [1, 1]} : vector<1x96xf32> to vector<1x32xf32>
    %218 = vector.extract_strided_slice %199 {offsets = [0, 64], sizes = [1, 32], strides = [1, 1]} : vector<1x96xf32> to vector<1x32xf32>
    %219 = arith.mulf %208, %218 : vector<1x32xf32>
    %220 = arith.addf %217, %219 : vector<1x32xf32>
    %221 = math.tanh %220 : vector<1x32xf32>
    %cst_94 = arith.constant 1.000000e+00 : f32
    %222 = vector.broadcast %cst_94 : f32 to vector<1x32xf32>
    %223 = arith.subf %222, %216 : vector<1x32xf32>
    %224 = arith.mulf %223, %221 : vector<1x32xf32>
    %225 = arith.mulf %216, %196 : vector<1x32xf32>
    %226 = arith.addf %224, %225 : vector<1x32xf32>
    %c5 = arith.constant 5 : index
    %c0_95 = arith.constant 0 : index
    %227 = vector.load %arg20[%c5, %c0_95] : memref<16x32xf32, #tpu.memory_space<vmem>>, vector<1x32xf32>
    tpu.vector_store %arg20[%c5, %c0_95], %226 {strides = array<i32>} : memref<16x32xf32, #tpu.memory_space<vmem>>, vector<1x32xf32>,
    %cst_96 = arith.constant dense<0.000000e+00> : vector<1x96xf32>
    %228 = tpu.matmul %226, %45, %cst_96 {dimension_numbers = #tpu.dot_dimension_numbers<[1], [0], [0], [1], [0, 0, 1, 1], [], []>} : vector<1x32xf32>, vector<32x96xf32>, vector<1x96xf32> -> vector<1x96xf32>
    %229 = arith.addf %228, %46 : vector<1x96xf32>
    %230 = vector.extract_strided_slice %44 {offsets = [6, 0], sizes = [1, 96], strides = [1, 1]} : vector<16x96xf32> to vector<1x96xf32>
    %231 = vector.extract_strided_slice %230 {offsets = [0, 0], sizes = [1, 32], strides = [1, 1]} : vector<1x96xf32> to vector<1x32xf32>
    %232 = vector.extract_strided_slice %229 {offsets = [0, 0], sizes = [1, 32], strides = [1, 1]} : vector<1x96xf32> to vector<1x32xf32>
    %233 = arith.addf %231, %232 : vector<1x32xf32>
    %234 = arith.negf %233 : vector<1x32xf32>
    %235 = math.exp %234 : vector<1x32xf32>
    %cst_97 = arith.constant 1.000000e+00 : f32
    %236 = vector.broadcast %cst_97 : f32 to vector<1x32xf32>
    %237 = arith.addf %236, %235 : vector<1x32xf32>
    %238 = arith.divf %236, %237 : vector<1x32xf32>
    %239 = vector.extract_strided_slice %230 {offsets = [0, 32], sizes = [1, 32], strides = [1, 1]} : vector<1x96xf32> to vector<1x32xf32>
    %240 = vector.extract_strided_slice %229 {offsets = [0, 32], sizes = [1, 32], strides = [1, 1]} : vector<1x96xf32> to vector<1x32xf32>
    %241 = arith.addf %239, %240 : vector<1x32xf32>
    %242 = arith.negf %241 : vector<1x32xf32>
    %243 = math.exp %242 : vector<1x32xf32>
    %cst_98 = arith.constant 1.000000e+00 : f32
    %244 = vector.broadcast %cst_98 : f32 to vector<1x32xf32>
    %245 = arith.addf %244, %243 : vector<1x32xf32>
    %246 = arith.divf %244, %245 : vector<1x32xf32>
    %247 = vector.extract_strided_slice %230 {offsets = [0, 64], sizes = [1, 32], strides = [1, 1]} : vector<1x96xf32> to vector<1x32xf32>
    %248 = vector.extract_strided_slice %229 {offsets = [0, 64], sizes = [1, 32], strides = [1, 1]} : vector<1x96xf32> to vector<1x32xf32>
    %249 = arith.mulf %238, %248 : vector<1x32xf32>
    %250 = arith.addf %247, %249 : vector<1x32xf32>
    %251 = math.tanh %250 : vector<1x32xf32>
    %cst_99 = arith.constant 1.000000e+00 : f32
    %252 = vector.broadcast %cst_99 : f32 to vector<1x32xf32>
    %253 = arith.subf %252, %246 : vector<1x32xf32>
    %254 = arith.mulf %253, %251 : vector<1x32xf32>
    %255 = arith.mulf %246, %226 : vector<1x32xf32>
    %256 = arith.addf %254, %255 : vector<1x32xf32>
    %c6 = arith.constant 6 : index
    %c0_100 = arith.constant 0 : index
    %257 = vector.load %arg20[%c6, %c0_100] : memref<16x32xf32, #tpu.memory_space<vmem>>, vector<1x32xf32>
    tpu.vector_store %arg20[%c6, %c0_100], %256 {strides = array<i32>} : memref<16x32xf32, #tpu.memory_space<vmem>>, vector<1x32xf32>,
    %cst_101 = arith.constant dense<0.000000e+00> : vector<1x96xf32>
    %258 = tpu.matmul %256, %45, %cst_101 {dimension_numbers = #tpu.dot_dimension_numbers<[1], [0], [0], [1], [0, 0, 1, 1], [], []>} : vector<1x32xf32>, vector<32x96xf32>, vector<1x96xf32> -> vector<1x96xf32>
    %259 = arith.addf %258, %46 : vector<1x96xf32>
    %260 = vector.extract_strided_slice %44 {offsets = [7, 0], sizes = [1, 96], strides = [1, 1]} : vector<16x96xf32> to vector<1x96xf32>
    %261 = vector.extract_strided_slice %260 {offsets = [0, 0], sizes = [1, 32], strides = [1, 1]} : vector<1x96xf32> to vector<1x32xf32>
    %262 = vector.extract_strided_slice %259 {offsets = [0, 0], sizes = [1, 32], strides = [1, 1]} : vector<1x96xf32> to vector<1x32xf32>
    %263 = arith.addf %261, %262 : vector<1x32xf32>
    %264 = arith.negf %263 : vector<1x32xf32>
    %265 = math.exp %264 : vector<1x32xf32>
    %cst_102 = arith.constant 1.000000e+00 : f32
    %266 = vector.broadcast %cst_102 : f32 to vector<1x32xf32>
    %267 = arith.addf %266, %265 : vector<1x32xf32>
    %268 = arith.divf %266, %267 : vector<1x32xf32>
    %269 = vector.extract_strided_slice %260 {offsets = [0, 32], sizes = [1, 32], strides = [1, 1]} : vector<1x96xf32> to vector<1x32xf32>
    %270 = vector.extract_strided_slice %259 {offsets = [0, 32], sizes = [1, 32], strides = [1, 1]} : vector<1x96xf32> to vector<1x32xf32>
    %271 = arith.addf %269, %270 : vector<1x32xf32>
    %272 = arith.negf %271 : vector<1x32xf32>
    %273 = math.exp %272 : vector<1x32xf32>
    %cst_103 = arith.constant 1.000000e+00 : f32
    %274 = vector.broadcast %cst_103 : f32 to vector<1x32xf32>
    %275 = arith.addf %274, %273 : vector<1x32xf32>
    %276 = arith.divf %274, %275 : vector<1x32xf32>
    %277 = vector.extract_strided_slice %260 {offsets = [0, 64], sizes = [1, 32], strides = [1, 1]} : vector<1x96xf32> to vector<1x32xf32>
    %278 = vector.extract_strided_slice %259 {offsets = [0, 64], sizes = [1, 32], strides = [1, 1]} : vector<1x96xf32> to vector<1x32xf32>
    %279 = arith.mulf %268, %278 : vector<1x32xf32>
    %280 = arith.addf %277, %279 : vector<1x32xf32>
    %281 = math.tanh %280 : vector<1x32xf32>
    %cst_104 = arith.constant 1.000000e+00 : f32
    %282 = vector.broadcast %cst_104 : f32 to vector<1x32xf32>
    %283 = arith.subf %282, %276 : vector<1x32xf32>
    %284 = arith.mulf %283, %281 : vector<1x32xf32>
    %285 = arith.mulf %276, %256 : vector<1x32xf32>
    %286 = arith.addf %284, %285 : vector<1x32xf32>
    %c7 = arith.constant 7 : index
    %c0_105 = arith.constant 0 : index
    %287 = vector.load %arg20[%c7, %c0_105] : memref<16x32xf32, #tpu.memory_space<vmem>>, vector<1x32xf32>
    tpu.vector_store %arg20[%c7, %c0_105], %286 {strides = array<i32>} : memref<16x32xf32, #tpu.memory_space<vmem>>, vector<1x32xf32>,
    %cst_106 = arith.constant dense<0.000000e+00> : vector<1x96xf32>
    %288 = tpu.matmul %286, %45, %cst_106 {dimension_numbers = #tpu.dot_dimension_numbers<[1], [0], [0], [1], [0, 0, 1, 1], [], []>} : vector<1x32xf32>, vector<32x96xf32>, vector<1x96xf32> -> vector<1x96xf32>
    %289 = arith.addf %288, %46 : vector<1x96xf32>
    %290 = vector.extract_strided_slice %44 {offsets = [8, 0], sizes = [1, 96], strides = [1, 1]} : vector<16x96xf32> to vector<1x96xf32>
    %291 = vector.extract_strided_slice %290 {offsets = [0, 0], sizes = [1, 32], strides = [1, 1]} : vector<1x96xf32> to vector<1x32xf32>
    %292 = vector.extract_strided_slice %289 {offsets = [0, 0], sizes = [1, 32], strides = [1, 1]} : vector<1x96xf32> to vector<1x32xf32>
    %293 = arith.addf %291, %292 : vector<1x32xf32>
    %294 = arith.negf %293 : vector<1x32xf32>
    %295 = math.exp %294 : vector<1x32xf32>
    %cst_107 = arith.constant 1.000000e+00 : f32
    %296 = vector.broadcast %cst_107 : f32 to vector<1x32xf32>
    %297 = arith.addf %296, %295 : vector<1x32xf32>
    %298 = arith.divf %296, %297 : vector<1x32xf32>
    %299 = vector.extract_strided_slice %290 {offsets = [0, 32], sizes = [1, 32], strides = [1, 1]} : vector<1x96xf32> to vector<1x32xf32>
    %300 = vector.extract_strided_slice %289 {offsets = [0, 32], sizes = [1, 32], strides = [1, 1]} : vector<1x96xf32> to vector<1x32xf32>
    %301 = arith.addf %299, %300 : vector<1x32xf32>
    %302 = arith.negf %301 : vector<1x32xf32>
    %303 = math.exp %302 : vector<1x32xf32>
    %cst_108 = arith.constant 1.000000e+00 : f32
    %304 = vector.broadcast %cst_108 : f32 to vector<1x32xf32>
    %305 = arith.addf %304, %303 : vector<1x32xf32>
    %306 = arith.divf %304, %305 : vector<1x32xf32>
    %307 = vector.extract_strided_slice %290 {offsets = [0, 64], sizes = [1, 32], strides = [1, 1]} : vector<1x96xf32> to vector<1x32xf32>
    %308 = vector.extract_strided_slice %289 {offsets = [0, 64], sizes = [1, 32], strides = [1, 1]} : vector<1x96xf32> to vector<1x32xf32>
    %309 = arith.mulf %298, %308 : vector<1x32xf32>
    %310 = arith.addf %307, %309 : vector<1x32xf32>
    %311 = math.tanh %310 : vector<1x32xf32>
    %cst_109 = arith.constant 1.000000e+00 : f32
    %312 = vector.broadcast %cst_109 : f32 to vector<1x32xf32>
    %313 = arith.subf %312, %306 : vector<1x32xf32>
    %314 = arith.mulf %313, %311 : vector<1x32xf32>
    %315 = arith.mulf %306, %286 : vector<1x32xf32>
    %316 = arith.addf %314, %315 : vector<1x32xf32>
    %c8 = arith.constant 8 : index
    %c0_110 = arith.constant 0 : index
    %317 = vector.load %arg20[%c8, %c0_110] : memref<16x32xf32, #tpu.memory_space<vmem>>, vector<1x32xf32>
    tpu.vector_store %arg20[%c8, %c0_110], %316 {strides = array<i32>} : memref<16x32xf32, #tpu.memory_space<vmem>>, vector<1x32xf32>,
    %cst_111 = arith.constant dense<0.000000e+00> : vector<1x96xf32>
    %318 = tpu.matmul %316, %45, %cst_111 {dimension_numbers = #tpu.dot_dimension_numbers<[1], [0], [0], [1], [0, 0, 1, 1], [], []>} : vector<1x32xf32>, vector<32x96xf32>, vector<1x96xf32> -> vector<1x96xf32>
    %319 = arith.addf %318, %46 : vector<1x96xf32>
    %320 = vector.extract_strided_slice %44 {offsets = [9, 0], sizes = [1, 96], strides = [1, 1]} : vector<16x96xf32> to vector<1x96xf32>
    %321 = vector.extract_strided_slice %320 {offsets = [0, 0], sizes = [1, 32], strides = [1, 1]} : vector<1x96xf32> to vector<1x32xf32>
    %322 = vector.extract_strided_slice %319 {offsets = [0, 0], sizes = [1, 32], strides = [1, 1]} : vector<1x96xf32> to vector<1x32xf32>
    %323 = arith.addf %321, %322 : vector<1x32xf32>
    %324 = arith.negf %323 : vector<1x32xf32>
    %325 = math.exp %324 : vector<1x32xf32>
    %cst_112 = arith.constant 1.000000e+00 : f32
    %326 = vector.broadcast %cst_112 : f32 to vector<1x32xf32>
    %327 = arith.addf %326, %325 : vector<1x32xf32>
    %328 = arith.divf %326, %327 : vector<1x32xf32>
    %329 = vector.extract_strided_slice %320 {offsets = [0, 32], sizes = [1, 32], strides = [1, 1]} : vector<1x96xf32> to vector<1x32xf32>
    %330 = vector.extract_strided_slice %319 {offsets = [0, 32], sizes = [1, 32], strides = [1, 1]} : vector<1x96xf32> to vector<1x32xf32>
    %331 = arith.addf %329, %330 : vector<1x32xf32>
    %332 = arith.negf %331 : vector<1x32xf32>
    %333 = math.exp %332 : vector<1x32xf32>
    %cst_113 = arith.constant 1.000000e+00 : f32
    %334 = vector.broadcast %cst_113 : f32 to vector<1x32xf32>
    %335 = arith.addf %334, %333 : vector<1x32xf32>
    %336 = arith.divf %334, %335 : vector<1x32xf32>
    %337 = vector.extract_strided_slice %320 {offsets = [0, 64], sizes = [1, 32], strides = [1, 1]} : vector<1x96xf32> to vector<1x32xf32>
    %338 = vector.extract_strided_slice %319 {offsets = [0, 64], sizes = [1, 32], strides = [1, 1]} : vector<1x96xf32> to vector<1x32xf32>
    %339 = arith.mulf %328, %338 : vector<1x32xf32>
    %340 = arith.addf %337, %339 : vector<1x32xf32>
    %341 = math.tanh %340 : vector<1x32xf32>
    %cst_114 = arith.constant 1.000000e+00 : f32
    %342 = vector.broadcast %cst_114 : f32 to vector<1x32xf32>
    %343 = arith.subf %342, %336 : vector<1x32xf32>
    %344 = arith.mulf %343, %341 : vector<1x32xf32>
    %345 = arith.mulf %336, %316 : vector<1x32xf32>
    %346 = arith.addf %344, %345 : vector<1x32xf32>
    %c9 = arith.constant 9 : index
    %c0_115 = arith.constant 0 : index
    %347 = vector.load %arg20[%c9, %c0_115] : memref<16x32xf32, #tpu.memory_space<vmem>>, vector<1x32xf32>
    tpu.vector_store %arg20[%c9, %c0_115], %346 {strides = array<i32>} : memref<16x32xf32, #tpu.memory_space<vmem>>, vector<1x32xf32>,
    %cst_116 = arith.constant dense<0.000000e+00> : vector<1x96xf32>
    %348 = tpu.matmul %346, %45, %cst_116 {dimension_numbers = #tpu.dot_dimension_numbers<[1], [0], [0], [1], [0, 0, 1, 1], [], []>} : vector<1x32xf32>, vector<32x96xf32>, vector<1x96xf32> -> vector<1x96xf32>
    %349 = arith.addf %348, %46 : vector<1x96xf32>
    %350 = vector.extract_strided_slice %44 {offsets = [10, 0], sizes = [1, 96], strides = [1, 1]} : vector<16x96xf32> to vector<1x96xf32>
    %351 = vector.extract_strided_slice %350 {offsets = [0, 0], sizes = [1, 32], strides = [1, 1]} : vector<1x96xf32> to vector<1x32xf32>
    %352 = vector.extract_strided_slice %349 {offsets = [0, 0], sizes = [1, 32], strides = [1, 1]} : vector<1x96xf32> to vector<1x32xf32>
    %353 = arith.addf %351, %352 : vector<1x32xf32>
    %354 = arith.negf %353 : vector<1x32xf32>
    %355 = math.exp %354 : vector<1x32xf32>
    %cst_117 = arith.constant 1.000000e+00 : f32
    %356 = vector.broadcast %cst_117 : f32 to vector<1x32xf32>
    %357 = arith.addf %356, %355 : vector<1x32xf32>
    %358 = arith.divf %356, %357 : vector<1x32xf32>
    %359 = vector.extract_strided_slice %350 {offsets = [0, 32], sizes = [1, 32], strides = [1, 1]} : vector<1x96xf32> to vector<1x32xf32>
    %360 = vector.extract_strided_slice %349 {offsets = [0, 32], sizes = [1, 32], strides = [1, 1]} : vector<1x96xf32> to vector<1x32xf32>
    %361 = arith.addf %359, %360 : vector<1x32xf32>
    %362 = arith.negf %361 : vector<1x32xf32>
    %363 = math.exp %362 : vector<1x32xf32>
    %cst_118 = arith.constant 1.000000e+00 : f32
    %364 = vector.broadcast %cst_118 : f32 to vector<1x32xf32>
    %365 = arith.addf %364, %363 : vector<1x32xf32>
    %366 = arith.divf %364, %365 : vector<1x32xf32>
    %367 = vector.extract_strided_slice %350 {offsets = [0, 64], sizes = [1, 32], strides = [1, 1]} : vector<1x96xf32> to vector<1x32xf32>
    %368 = vector.extract_strided_slice %349 {offsets = [0, 64], sizes = [1, 32], strides = [1, 1]} : vector<1x96xf32> to vector<1x32xf32>
    %369 = arith.mulf %358, %368 : vector<1x32xf32>
    %370 = arith.addf %367, %369 : vector<1x32xf32>
    %371 = math.tanh %370 : vector<1x32xf32>
    %cst_119 = arith.constant 1.000000e+00 : f32
    %372 = vector.broadcast %cst_119 : f32 to vector<1x32xf32>
    %373 = arith.subf %372, %366 : vector<1x32xf32>
    %374 = arith.mulf %373, %371 : vector<1x32xf32>
    %375 = arith.mulf %366, %346 : vector<1x32xf32>
    %376 = arith.addf %374, %375 : vector<1x32xf32>
    %c10 = arith.constant 10 : index
    %c0_120 = arith.constant 0 : index
    %377 = vector.load %arg20[%c10, %c0_120] : memref<16x32xf32, #tpu.memory_space<vmem>>, vector<1x32xf32>
    tpu.vector_store %arg20[%c10, %c0_120], %376 {strides = array<i32>} : memref<16x32xf32, #tpu.memory_space<vmem>>, vector<1x32xf32>,
    %cst_121 = arith.constant dense<0.000000e+00> : vector<1x96xf32>
    %378 = tpu.matmul %376, %45, %cst_121 {dimension_numbers = #tpu.dot_dimension_numbers<[1], [0], [0], [1], [0, 0, 1, 1], [], []>} : vector<1x32xf32>, vector<32x96xf32>, vector<1x96xf32> -> vector<1x96xf32>
    %379 = arith.addf %378, %46 : vector<1x96xf32>
    %380 = vector.extract_strided_slice %44 {offsets = [11, 0], sizes = [1, 96], strides = [1, 1]} : vector<16x96xf32> to vector<1x96xf32>
    %381 = vector.extract_strided_slice %380 {offsets = [0, 0], sizes = [1, 32], strides = [1, 1]} : vector<1x96xf32> to vector<1x32xf32>
    %382 = vector.extract_strided_slice %379 {offsets = [0, 0], sizes = [1, 32], strides = [1, 1]} : vector<1x96xf32> to vector<1x32xf32>
    %383 = arith.addf %381, %382 : vector<1x32xf32>
    %384 = arith.negf %383 : vector<1x32xf32>
    %385 = math.exp %384 : vector<1x32xf32>
    %cst_122 = arith.constant 1.000000e+00 : f32
    %386 = vector.broadcast %cst_122 : f32 to vector<1x32xf32>
    %387 = arith.addf %386, %385 : vector<1x32xf32>
    %388 = arith.divf %386, %387 : vector<1x32xf32>
    %389 = vector.extract_strided_slice %380 {offsets = [0, 32], sizes = [1, 32], strides = [1, 1]} : vector<1x96xf32> to vector<1x32xf32>
    %390 = vector.extract_strided_slice %379 {offsets = [0, 32], sizes = [1, 32], strides = [1, 1]} : vector<1x96xf32> to vector<1x32xf32>
    %391 = arith.addf %389, %390 : vector<1x32xf32>
    %392 = arith.negf %391 : vector<1x32xf32>
    %393 = math.exp %392 : vector<1x32xf32>
    %cst_123 = arith.constant 1.000000e+00 : f32
    %394 = vector.broadcast %cst_123 : f32 to vector<1x32xf32>
    %395 = arith.addf %394, %393 : vector<1x32xf32>
    %396 = arith.divf %394, %395 : vector<1x32xf32>
    %397 = vector.extract_strided_slice %380 {offsets = [0, 64], sizes = [1, 32], strides = [1, 1]} : vector<1x96xf32> to vector<1x32xf32>
    %398 = vector.extract_strided_slice %379 {offsets = [0, 64], sizes = [1, 32], strides = [1, 1]} : vector<1x96xf32> to vector<1x32xf32>
    %399 = arith.mulf %388, %398 : vector<1x32xf32>
    %400 = arith.addf %397, %399 : vector<1x32xf32>
    %401 = math.tanh %400 : vector<1x32xf32>
    %cst_124 = arith.constant 1.000000e+00 : f32
    %402 = vector.broadcast %cst_124 : f32 to vector<1x32xf32>
    %403 = arith.subf %402, %396 : vector<1x32xf32>
    %404 = arith.mulf %403, %401 : vector<1x32xf32>
    %405 = arith.mulf %396, %376 : vector<1x32xf32>
    %406 = arith.addf %404, %405 : vector<1x32xf32>
    %c11 = arith.constant 11 : index
    %c0_125 = arith.constant 0 : index
    %407 = vector.load %arg20[%c11, %c0_125] : memref<16x32xf32, #tpu.memory_space<vmem>>, vector<1x32xf32>
    tpu.vector_store %arg20[%c11, %c0_125], %406 {strides = array<i32>} : memref<16x32xf32, #tpu.memory_space<vmem>>, vector<1x32xf32>,
    %cst_126 = arith.constant dense<0.000000e+00> : vector<1x96xf32>
    %408 = tpu.matmul %406, %45, %cst_126 {dimension_numbers = #tpu.dot_dimension_numbers<[1], [0], [0], [1], [0, 0, 1, 1], [], []>} : vector<1x32xf32>, vector<32x96xf32>, vector<1x96xf32> -> vector<1x96xf32>
    %409 = arith.addf %408, %46 : vector<1x96xf32>
    %410 = vector.extract_strided_slice %44 {offsets = [12, 0], sizes = [1, 96], strides = [1, 1]} : vector<16x96xf32> to vector<1x96xf32>
    %411 = vector.extract_strided_slice %410 {offsets = [0, 0], sizes = [1, 32], strides = [1, 1]} : vector<1x96xf32> to vector<1x32xf32>
    %412 = vector.extract_strided_slice %409 {offsets = [0, 0], sizes = [1, 32], strides = [1, 1]} : vector<1x96xf32> to vector<1x32xf32>
    %413 = arith.addf %411, %412 : vector<1x32xf32>
    %414 = arith.negf %413 : vector<1x32xf32>
    %415 = math.exp %414 : vector<1x32xf32>
    %cst_127 = arith.constant 1.000000e+00 : f32
    %416 = vector.broadcast %cst_127 : f32 to vector<1x32xf32>
    %417 = arith.addf %416, %415 : vector<1x32xf32>
    %418 = arith.divf %416, %417 : vector<1x32xf32>
    %419 = vector.extract_strided_slice %410 {offsets = [0, 32], sizes = [1, 32], strides = [1, 1]} : vector<1x96xf32> to vector<1x32xf32>
    %420 = vector.extract_strided_slice %409 {offsets = [0, 32], sizes = [1, 32], strides = [1, 1]} : vector<1x96xf32> to vector<1x32xf32>
    %421 = arith.addf %419, %420 : vector<1x32xf32>
    %422 = arith.negf %421 : vector<1x32xf32>
    %423 = math.exp %422 : vector<1x32xf32>
    %cst_128 = arith.constant 1.000000e+00 : f32
    %424 = vector.broadcast %cst_128 : f32 to vector<1x32xf32>
    %425 = arith.addf %424, %423 : vector<1x32xf32>
    %426 = arith.divf %424, %425 : vector<1x32xf32>
    %427 = vector.extract_strided_slice %410 {offsets = [0, 64], sizes = [1, 32], strides = [1, 1]} : vector<1x96xf32> to vector<1x32xf32>
    %428 = vector.extract_strided_slice %409 {offsets = [0, 64], sizes = [1, 32], strides = [1, 1]} : vector<1x96xf32> to vector<1x32xf32>
    %429 = arith.mulf %418, %428 : vector<1x32xf32>
    %430 = arith.addf %427, %429 : vector<1x32xf32>
    %431 = math.tanh %430 : vector<1x32xf32>
    %cst_129 = arith.constant 1.000000e+00 : f32
    %432 = vector.broadcast %cst_129 : f32 to vector<1x32xf32>
    %433 = arith.subf %432, %426 : vector<1x32xf32>
    %434 = arith.mulf %433, %431 : vector<1x32xf32>
    %435 = arith.mulf %426, %406 : vector<1x32xf32>
    %436 = arith.addf %434, %435 : vector<1x32xf32>
    %c12 = arith.constant 12 : index
    %c0_130 = arith.constant 0 : index
    %437 = vector.load %arg20[%c12, %c0_130] : memref<16x32xf32, #tpu.memory_space<vmem>>, vector<1x32xf32>
    tpu.vector_store %arg20[%c12, %c0_130], %436 {strides = array<i32>} : memref<16x32xf32, #tpu.memory_space<vmem>>, vector<1x32xf32>,
    %cst_131 = arith.constant dense<0.000000e+00> : vector<1x96xf32>
    %438 = tpu.matmul %436, %45, %cst_131 {dimension_numbers = #tpu.dot_dimension_numbers<[1], [0], [0], [1], [0, 0, 1, 1], [], []>} : vector<1x32xf32>, vector<32x96xf32>, vector<1x96xf32> -> vector<1x96xf32>
    %439 = arith.addf %438, %46 : vector<1x96xf32>
    %440 = vector.extract_strided_slice %44 {offsets = [13, 0], sizes = [1, 96], strides = [1, 1]} : vector<16x96xf32> to vector<1x96xf32>
    %441 = vector.extract_strided_slice %440 {offsets = [0, 0], sizes = [1, 32], strides = [1, 1]} : vector<1x96xf32> to vector<1x32xf32>
    %442 = vector.extract_strided_slice %439 {offsets = [0, 0], sizes = [1, 32], strides = [1, 1]} : vector<1x96xf32> to vector<1x32xf32>
    %443 = arith.addf %441, %442 : vector<1x32xf32>
    %444 = arith.negf %443 : vector<1x32xf32>
    %445 = math.exp %444 : vector<1x32xf32>
    %cst_132 = arith.constant 1.000000e+00 : f32
    %446 = vector.broadcast %cst_132 : f32 to vector<1x32xf32>
    %447 = arith.addf %446, %445 : vector<1x32xf32>
    %448 = arith.divf %446, %447 : vector<1x32xf32>
    %449 = vector.extract_strided_slice %440 {offsets = [0, 32], sizes = [1, 32], strides = [1, 1]} : vector<1x96xf32> to vector<1x32xf32>
    %450 = vector.extract_strided_slice %439 {offsets = [0, 32], sizes = [1, 32], strides = [1, 1]} : vector<1x96xf32> to vector<1x32xf32>
    %451 = arith.addf %449, %450 : vector<1x32xf32>
    %452 = arith.negf %451 : vector<1x32xf32>
    %453 = math.exp %452 : vector<1x32xf32>
    %cst_133 = arith.constant 1.000000e+00 : f32
    %454 = vector.broadcast %cst_133 : f32 to vector<1x32xf32>
    %455 = arith.addf %454, %453 : vector<1x32xf32>
    %456 = arith.divf %454, %455 : vector<1x32xf32>
    %457 = vector.extract_strided_slice %440 {offsets = [0, 64], sizes = [1, 32], strides = [1, 1]} : vector<1x96xf32> to vector<1x32xf32>
    %458 = vector.extract_strided_slice %439 {offsets = [0, 64], sizes = [1, 32], strides = [1, 1]} : vector<1x96xf32> to vector<1x32xf32>
    %459 = arith.mulf %448, %458 : vector<1x32xf32>
    %460 = arith.addf %457, %459 : vector<1x32xf32>
    %461 = math.tanh %460 : vector<1x32xf32>
    %cst_134 = arith.constant 1.000000e+00 : f32
    %462 = vector.broadcast %cst_134 : f32 to vector<1x32xf32>
    %463 = arith.subf %462, %456 : vector<1x32xf32>
    %464 = arith.mulf %463, %461 : vector<1x32xf32>
    %465 = arith.mulf %456, %436 : vector<1x32xf32>
    %466 = arith.addf %464, %465 : vector<1x32xf32>
    %c13 = arith.constant 13 : index
    %c0_135 = arith.constant 0 : index
    %467 = vector.load %arg20[%c13, %c0_135] : memref<16x32xf32, #tpu.memory_space<vmem>>, vector<1x32xf32>
    tpu.vector_store %arg20[%c13, %c0_135], %466 {strides = array<i32>} : memref<16x32xf32, #tpu.memory_space<vmem>>, vector<1x32xf32>,
    %cst_136 = arith.constant dense<0.000000e+00> : vector<1x96xf32>
    %468 = tpu.matmul %466, %45, %cst_136 {dimension_numbers = #tpu.dot_dimension_numbers<[1], [0], [0], [1], [0, 0, 1, 1], [], []>} : vector<1x32xf32>, vector<32x96xf32>, vector<1x96xf32> -> vector<1x96xf32>
    %469 = arith.addf %468, %46 : vector<1x96xf32>
    %470 = vector.extract_strided_slice %44 {offsets = [14, 0], sizes = [1, 96], strides = [1, 1]} : vector<16x96xf32> to vector<1x96xf32>
    %471 = vector.extract_strided_slice %470 {offsets = [0, 0], sizes = [1, 32], strides = [1, 1]} : vector<1x96xf32> to vector<1x32xf32>
    %472 = vector.extract_strided_slice %469 {offsets = [0, 0], sizes = [1, 32], strides = [1, 1]} : vector<1x96xf32> to vector<1x32xf32>
    %473 = arith.addf %471, %472 : vector<1x32xf32>
    %474 = arith.negf %473 : vector<1x32xf32>
    %475 = math.exp %474 : vector<1x32xf32>
    %cst_137 = arith.constant 1.000000e+00 : f32
    %476 = vector.broadcast %cst_137 : f32 to vector<1x32xf32>
    %477 = arith.addf %476, %475 : vector<1x32xf32>
    %478 = arith.divf %476, %477 : vector<1x32xf32>
    %479 = vector.extract_strided_slice %470 {offsets = [0, 32], sizes = [1, 32], strides = [1, 1]} : vector<1x96xf32> to vector<1x32xf32>
    %480 = vector.extract_strided_slice %469 {offsets = [0, 32], sizes = [1, 32], strides = [1, 1]} : vector<1x96xf32> to vector<1x32xf32>
    %481 = arith.addf %479, %480 : vector<1x32xf32>
    %482 = arith.negf %481 : vector<1x32xf32>
    %483 = math.exp %482 : vector<1x32xf32>
    %cst_138 = arith.constant 1.000000e+00 : f32
    %484 = vector.broadcast %cst_138 : f32 to vector<1x32xf32>
    %485 = arith.addf %484, %483 : vector<1x32xf32>
    %486 = arith.divf %484, %485 : vector<1x32xf32>
    %487 = vector.extract_strided_slice %470 {offsets = [0, 64], sizes = [1, 32], strides = [1, 1]} : vector<1x96xf32> to vector<1x32xf32>
    %488 = vector.extract_strided_slice %469 {offsets = [0, 64], sizes = [1, 32], strides = [1, 1]} : vector<1x96xf32> to vector<1x32xf32>
    %489 = arith.mulf %478, %488 : vector<1x32xf32>
    %490 = arith.addf %487, %489 : vector<1x32xf32>
    %491 = math.tanh %490 : vector<1x32xf32>
    %cst_139 = arith.constant 1.000000e+00 : f32
    %492 = vector.broadcast %cst_139 : f32 to vector<1x32xf32>
    %493 = arith.subf %492, %486 : vector<1x32xf32>
    %494 = arith.mulf %493, %491 : vector<1x32xf32>
    %495 = arith.mulf %486, %466 : vector<1x32xf32>
    %496 = arith.addf %494, %495 : vector<1x32xf32>
    %c14 = arith.constant 14 : index
    %c0_140 = arith.constant 0 : index
    %497 = vector.load %arg20[%c14, %c0_140] : memref<16x32xf32, #tpu.memory_space<vmem>>, vector<1x32xf32>
    tpu.vector_store %arg20[%c14, %c0_140], %496 {strides = array<i32>} : memref<16x32xf32, #tpu.memory_space<vmem>>, vector<1x32xf32>,
    %cst_141 = arith.constant dense<0.000000e+00> : vector<1x96xf32>
    %498 = tpu.matmul %496, %45, %cst_141 {dimension_numbers = #tpu.dot_dimension_numbers<[1], [0], [0], [1], [0, 0, 1, 1], [], []>} : vector<1x32xf32>, vector<32x96xf32>, vector<1x96xf32> -> vector<1x96xf32>
    %499 = arith.addf %498, %46 : vector<1x96xf32>
    %500 = vector.extract_strided_slice %44 {offsets = [15, 0], sizes = [1, 96], strides = [1, 1]} : vector<16x96xf32> to vector<1x96xf32>
    %501 = vector.extract_strided_slice %500 {offsets = [0, 0], sizes = [1, 32], strides = [1, 1]} : vector<1x96xf32> to vector<1x32xf32>
    %502 = vector.extract_strided_slice %499 {offsets = [0, 0], sizes = [1, 32], strides = [1, 1]} : vector<1x96xf32> to vector<1x32xf32>
    %503 = arith.addf %501, %502 : vector<1x32xf32>
    %504 = arith.negf %503 : vector<1x32xf32>
    %505 = math.exp %504 : vector<1x32xf32>
    %cst_142 = arith.constant 1.000000e+00 : f32
    %506 = vector.broadcast %cst_142 : f32 to vector<1x32xf32>
    %507 = arith.addf %506, %505 : vector<1x32xf32>
    %508 = arith.divf %506, %507 : vector<1x32xf32>
    %509 = vector.extract_strided_slice %500 {offsets = [0, 32], sizes = [1, 32], strides = [1, 1]} : vector<1x96xf32> to vector<1x32xf32>
    %510 = vector.extract_strided_slice %499 {offsets = [0, 32], sizes = [1, 32], strides = [1, 1]} : vector<1x96xf32> to vector<1x32xf32>
    %511 = arith.addf %509, %510 : vector<1x32xf32>
    %512 = arith.negf %511 : vector<1x32xf32>
    %513 = math.exp %512 : vector<1x32xf32>
    %cst_143 = arith.constant 1.000000e+00 : f32
    %514 = vector.broadcast %cst_143 : f32 to vector<1x32xf32>
    %515 = arith.addf %514, %513 : vector<1x32xf32>
    %516 = arith.divf %514, %515 : vector<1x32xf32>
    %517 = vector.extract_strided_slice %500 {offsets = [0, 64], sizes = [1, 32], strides = [1, 1]} : vector<1x96xf32> to vector<1x32xf32>
    %518 = vector.extract_strided_slice %499 {offsets = [0, 64], sizes = [1, 32], strides = [1, 1]} : vector<1x96xf32> to vector<1x32xf32>
    %519 = arith.mulf %508, %518 : vector<1x32xf32>
    %520 = arith.addf %517, %519 : vector<1x32xf32>
    %521 = math.tanh %520 : vector<1x32xf32>
    %cst_144 = arith.constant 1.000000e+00 : f32
    %522 = vector.broadcast %cst_144 : f32 to vector<1x32xf32>
    %523 = arith.subf %522, %516 : vector<1x32xf32>
    %524 = arith.mulf %523, %521 : vector<1x32xf32>
    %525 = arith.mulf %516, %496 : vector<1x32xf32>
    %526 = arith.addf %524, %525 : vector<1x32xf32>
    %c15 = arith.constant 15 : index
    %c0_145 = arith.constant 0 : index
    %527 = vector.load %arg20[%c15, %c0_145] : memref<16x32xf32, #tpu.memory_space<vmem>>, vector<1x32xf32>
    tpu.vector_store %arg20[%c15, %c0_145], %526 {strides = array<i32>} : memref<16x32xf32, #tpu.memory_space<vmem>>, vector<1x32xf32>,
    %c0_146 = arith.constant 0 : index
    %c0_147 = arith.constant 0 : index
    %528 = vector.load %arg20[%c0_146, %c0_147] : memref<16x32xf32, #tpu.memory_space<vmem>>, vector<16x32xf32>
    %cst_148 = arith.constant 0.000000e+00 : f32
    %529 = vector.broadcast %cst_148 : f32 to vector<16x32xf32>
    %530 = arith.maximumf %528, %529 : vector<16x32xf32>
    %c0_149 = arith.constant 0 : index
    %c0_150 = arith.constant 0 : index
    %531 = vector.load %arg12[%c0_149, %c0_150] : memref<32x32xf32, #tpu.memory_space<vmem>>, vector<32x32xf32>
    %cst_151 = arith.constant dense<0.000000e+00> : vector<16x32xf32>
    %532 = tpu.matmul %530, %531, %cst_151 {dimension_numbers = #tpu.dot_dimension_numbers<[1], [0], [0], [1], [0, 0, 1, 1], [], []>} : vector<16x32xf32>, vector<32x32xf32>, vector<16x32xf32> -> vector<16x32xf32>
    %c0_152 = arith.constant 0 : index
    %c0_153 = arith.constant 0 : index
    %533 = vector.load %arg13[%c0_152, %c0_153] : memref<1x32xf32, #tpu.memory_space<vmem>>, vector<1x32xf32>
    %534 = vector.broadcast %533 : vector<1x32xf32> to vector<16x32xf32>
    %535 = arith.addf %532, %534 : vector<16x32xf32>
    %cst_154 = arith.constant 0.000000e+00 : f32
    %536 = vector.broadcast %cst_154 : f32 to vector<16x32xf32>
    %537 = arith.maximumf %535, %536 : vector<16x32xf32>
    %c0_155 = arith.constant 0 : index
    %c0_156 = arith.constant 0 : index
    %538 = vector.load %arg14[%c0_155, %c0_156] : memref<32x32xf32, #tpu.memory_space<vmem>>, vector<32x32xf32>
    %cst_157 = arith.constant dense<0.000000e+00> : vector<16x32xf32>
    %539 = tpu.matmul %537, %538, %cst_157 {dimension_numbers = #tpu.dot_dimension_numbers<[1], [0], [0], [1], [0, 0, 1, 1], [], []>} : vector<16x32xf32>, vector<32x32xf32>, vector<16x32xf32> -> vector<16x32xf32>
    %c0_158 = arith.constant 0 : index
    %c0_159 = arith.constant 0 : index
    %540 = vector.load %arg15[%c0_158, %c0_159] : memref<1x32xf32, #tpu.memory_space<vmem>>, vector<1x32xf32>
    %541 = vector.broadcast %540 : vector<1x32xf32> to vector<16x32xf32>
    %542 = arith.addf %539, %541 : vector<16x32xf32>
    %cst_160 = arith.constant 0.000000e+00 : f32
    %543 = vector.broadcast %cst_160 : f32 to vector<16x32xf32>
    %544 = arith.maximumf %542, %543 : vector<16x32xf32>
    %c0_161 = arith.constant 0 : index
    %c0_162 = arith.constant 0 : index
    %545 = vector.load %arg16[%c0_161, %c0_162] : memref<32x4xf32, #tpu.memory_space<vmem>>, vector<32x4xf32>
    %cst_163 = arith.constant dense<0.000000e+00> : vector<16x4xf32>
    %546 = tpu.matmul %544, %545, %cst_163 {dimension_numbers = #tpu.dot_dimension_numbers<[1], [0], [0], [1], [0, 0, 1, 1], [], []>} : vector<16x32xf32>, vector<32x4xf32>, vector<16x4xf32> -> vector<16x4xf32>
    %c0_164 = arith.constant 0 : index
    %c0_165 = arith.constant 0 : index
    %547 = vector.load %arg17[%c0_164, %c0_165] : memref<1x4xf32, #tpu.memory_space<vmem>>, vector<1x4xf32>
    %548 = vector.broadcast %547 : vector<1x4xf32> to vector<16x4xf32>
    %549 = arith.addf %546, %548 : vector<16x4xf32>
    %c0_166 = arith.constant 0 : index
    %c0_167 = arith.constant 0 : index
    %c0_168 = arith.constant 0 : index
    %550 = vector.load %arg18[%c0_166, %c0_167, %c0_168] : memref<1x16x4xf32, #tpu.memory_space<vmem>>, vector<1x16x4xf32>
    %551 = vector.shape_cast %550 : vector<1x16x4xf32> to vector<16x4xf32>
    %552 = vector.shape_cast %549 : vector<16x4xf32> to vector<1x16x4xf32>
    tpu.vector_store %arg18[%c0_166, %c0_167, %c0_168], %552 {strides = array<i32>} : memref<1x16x4xf32, #tpu.memory_space<vmem>>, vector<1x16x4xf32>,
    return
  }
  func.func @transform_0(%arg0: i32) -> (i32, i32, i32) {
    %c0_i32 = arith.constant 0 : i32
    %c0_i32_0 = arith.constant 0 : i32
    %c0_i32_1 = arith.constant 0 : i32
    return %arg0, %c0_i32, %c0_i32_0 : i32, i32, i32
  }
  func.func @transform_1(%arg0: i32) -> (i32, i32) {
    %c0_i32 = arith.constant 0 : i32
    %c0_i32_0 = arith.constant 0 : i32
    %c0_i32_1 = arith.constant 0 : i32
    return %c0_i32, %c0_i32_0 : i32, i32
  }
  func.func @transform_2(%arg0: i32) -> (i32, i32) {
    %c0_i32 = arith.constant 0 : i32
    %c0_i32_0 = arith.constant 0 : i32
    %c0_i32_1 = arith.constant 0 : i32
    return %c0_i32, %c0_i32_0 : i32, i32
  }
  func.func @transform_3(%arg0: i32) -> (i32, i32) {
    %c0_i32 = arith.constant 0 : i32
    %c0_i32_0 = arith.constant 0 : i32
    %c0_i32_1 = arith.constant 0 : i32
    return %c0_i32, %c0_i32_0 : i32, i32
  }
  func.func @transform_4(%arg0: i32) -> (i32, i32) {
    %c0_i32 = arith.constant 0 : i32
    %c0_i32_0 = arith.constant 0 : i32
    %c0_i32_1 = arith.constant 0 : i32
    return %c0_i32, %c0_i32_0 : i32, i32
  }
  func.func @transform_5(%arg0: i32) -> (i32, i32) {
    %c0_i32 = arith.constant 0 : i32
    %c0_i32_0 = arith.constant 0 : i32
    %c0_i32_1 = arith.constant 0 : i32
    return %c0_i32, %c0_i32_0 : i32, i32
  }
  func.func @transform_6(%arg0: i32) -> (i32, i32) {
    %c0_i32 = arith.constant 0 : i32
    %c0_i32_0 = arith.constant 0 : i32
    %c0_i32_1 = arith.constant 0 : i32
    return %c0_i32, %c0_i32_0 : i32, i32
  }
  func.func @transform_7(%arg0: i32) -> (i32, i32) {
    %c0_i32 = arith.constant 0 : i32
    %c0_i32_0 = arith.constant 0 : i32
    %c0_i32_1 = arith.constant 0 : i32
    return %c0_i32, %c0_i32_0 : i32, i32
  }
  func.func @transform_8(%arg0: i32) -> (i32, i32) {
    %c0_i32 = arith.constant 0 : i32
    %c0_i32_0 = arith.constant 0 : i32
    %c0_i32_1 = arith.constant 0 : i32
    return %c0_i32, %c0_i32_0 : i32, i32
  }
  func.func @transform_9(%arg0: i32) -> (i32, i32) {
    %c0_i32 = arith.constant 0 : i32
    %c0_i32_0 = arith.constant 0 : i32
    %c0_i32_1 = arith.constant 0 : i32
    return %c0_i32, %c0_i32_0 : i32, i32
  }
  func.func @transform_10(%arg0: i32) -> (i32, i32) {
    %c0_i32 = arith.constant 0 : i32
    %c0_i32_0 = arith.constant 0 : i32
    %c0_i32_1 = arith.constant 0 : i32
    return %c0_i32, %c0_i32_0 : i32, i32
  }
  func.func @transform_11(%arg0: i32) -> (i32, i32) {
    %c0_i32 = arith.constant 0 : i32
    %c0_i32_0 = arith.constant 0 : i32
    %c0_i32_1 = arith.constant 0 : i32
    return %c0_i32, %c0_i32_0 : i32, i32
  }
  func.func @transform_12(%arg0: i32) -> (i32, i32) {
    %c0_i32 = arith.constant 0 : i32
    %c0_i32_0 = arith.constant 0 : i32
    %c0_i32_1 = arith.constant 0 : i32
    return %c0_i32, %c0_i32_0 : i32, i32
  }
  func.func @transform_13(%arg0: i32) -> (i32, i32) {
    %c0_i32 = arith.constant 0 : i32
    %c0_i32_0 = arith.constant 0 : i32
    %c0_i32_1 = arith.constant 0 : i32
    return %c0_i32, %c0_i32_0 : i32, i32
  }
  func.func @transform_14(%arg0: i32) -> (i32, i32) {
    %c0_i32 = arith.constant 0 : i32
    %c0_i32_0 = arith.constant 0 : i32
    %c0_i32_1 = arith.constant 0 : i32
    return %c0_i32, %c0_i32_0 : i32, i32
  }
  func.func @transform_15(%arg0: i32) -> (i32, i32) {
    %c0_i32 = arith.constant 0 : i32
    %c0_i32_0 = arith.constant 0 : i32
    %c0_i32_1 = arith.constant 0 : i32
    return %c0_i32, %c0_i32_0 : i32, i32
  }
  func.func @transform_16(%arg0: i32) -> (i32, i32) {
    %c0_i32 = arith.constant 0 : i32
    %c0_i32_0 = arith.constant 0 : i32
    %c0_i32_1 = arith.constant 0 : i32
    return %c0_i32, %c0_i32_0 : i32, i32
  }
  func.func @transform_17(%arg0: i32) -> (i32, i32, i32) {
    %c0_i32 = arith.constant 0 : i32
    %c0_i32_0 = arith.constant 0 : i32
    %c0_i32_1 = arith.constant 0 : i32
    return %arg0, %c0_i32, %c0_i32_0 : i32, i32, i32
  }
}

</mosaic_0001>

<bundles_post_ra>
// kernel: seq2seq_cnn_rnn_forward.1
= control target key start
LH: loop header
LB: loop body
LE: loop exit
PB: predicated region body
PF: predicated region fallthrough
CT: control target
= control target key end

     0   :  { %s3896_s24 = smov 0   ;;  %s4542_s0 = inlined_call_operand.vmem [shape: f32[2,16,8], index: 0, kind: input, shape index: {}]   ;;  %s4543_s1 = inlined_call_operand.vmem [shape: f32[40,16], index: 1, kind: input, shape index: {}]   ;;  %s4544_s2 = inlined_call_operand.vmem [shape: f32[1,16], index: 2, kind: input, shape index: {}]   ;;  %s4545_s3 = inlined_call_operand.vmem [shape: f32[80,16], index: 3, kind: input, shape index: {}]   ;;  %s4546_s4 = inlined_call_operand.vmem [shape: f32[1,16], index: 4, kind: input, shape index: {}]   ;;  %s4547_s5 = inlined_call_operand.vmem [shape: f32[80,16], index: 5, kind: input, shape index: {}]   ;;  %s4548_s6 = inlined_call_operand.vmem [shape: f32[1,16], index: 6, kind: input, shape index: {}]   ;;  %s4549_s7 = inlined_call_operand.vmem [shape: f32[16,96], index: 7, kind: input, shape index: {}]   ;;  %s4550_s8 = inlined_call_operand.vmem [shape: f32[32,96], index: 8, kind: input, shape index: {}]   ;;  %s4551_s9 = inlined_call_operand.vmem [shape: f32[1,96], index: 9, kind: input, shape index: {}]   ;;  %s4552_s10 = inlined_call_operand.vmem [shape: f32[1,96], index: 10, kind: input, shape index: {}]   ;;  %s4553_s11 = inlined_call_operand.vmem [shape: f32[32,32], index: 11, kind: input, shape index: {}]   ;;  %s4554_s12 = inlined_call_operand.vmem [shape: f32[1,32], index: 12, kind: input, shape index: {}]   ;;  %s4555_s13 = inlined_call_operand.vmem [shape: f32[32,32], index: 13, kind: input, shape index: {}]   ;;  %s4556_s14 = inlined_call_operand.vmem [shape: f32[1,32], index: 14, kind: input, shape index: {}]   ;;  %s4557_s15 = inlined_call_operand.vmem [shape: f32[32,4], index: 15, kind: input, shape index: {}]   ;;  %s4558_s16 = inlined_call_operand.vmem [shape: f32[1,4], index: 16, kind: input, shape index: {}]   ;;  %s4559_s17 = inlined_call_operand.vmem [shape: f32[2,16,4], index: 17, kind: output, shape index: {}]  }
   0x1   :  { %4562 = sst [smem:[#allocation4_spill]] %s4542_s0 }
   0x2   :  { %4563 = sst [smem:[#allocation5_spill]] %s4543_s1 }
   0x3 LB: > { %s3198_s25 = sadd.s32 4294967295, %s3795_s24   ;;  %p3202_p0 = scmp.ge.s32.totalorder %s3795_s24, 1  ;;  %s3795_s24 = sphi %s3896_s24, %s27_s24  }
   0x4   : > { %p487_p1 = scmp.lt.s32.totalorder %s3795_s24, 3 }
   0x6   : > { %p488_p2 = pnand %p3202_p0, %p487_p1 }
   0x7   : > { %p539_p3 = scmp.lt.s32.totalorder (!%p488_p2), %s3198_s25, 1  ;;  %s4564_s29 = sld [smem:[#allocation4_spill]] (!%p488_p2) }
   0x8   : > { %491 = sbr.rel (%p488_p2) target bundleno = 12523 (0x30eb), region = 88  ;;  %s4565_s19 = sld [smem:[#allocation5_spill]] (!%p488_p2) }
   0x9   : > { %s3799_s30 = smov (!%p488_p2), 8   ;;  %s3800_s18 = smov (!%p488_p2), 24  }
   0xa   : > { %s3801_s1 = smov (!%p488_p2), 32   ;;  %s3802_s27 = smov (!%p488_p2), 48  }
   0xb   : > { %s3803_s28 = smov (!%p488_p2), 64  }
   0xd   : > { %vm549_vm0 = vcmask 130048   ;;  %vm552_vm1 = vcmask 125952   ;;  %v3797_v0 = vmov 0.0   ;;  %s4568_s25 = smov (!%p539_p3, %s3198_s25), 1  ;;  %vm556_vm2 = vcmask 64512   ;;  %v768_v34 = vld [vmem:[%s4545_s3 + $0x48] sm:$0xff] }
   0xe   : > { %550 = vst.msk [vmem:[#allocation2] sm:$0xff] %vm549_vm0, %v3797_v0  ;;  %551 = vst.msk [vmem:[#allocation2 + $0x8] sm:$0xff] %vm549_vm0, %v3797_v0  ;;  %s4561_s26 = sshll.u32 %s4568_s25, 4  ;;  %v615_v1 = vld [vmem:[%s4565_s19 + $0x20] sm:$0xff]  ;;  %v614_v4 = vld [vmem:[%s4565_s19 + $0x18] sm:$0xff]  ;;  %vm605_vm3 = vcmask 195584   ;;  %3409 = vmatprep.subr.mxu1 %v768_v34 }
   0xf   : > { %553 = vst.msk [vmem:[#allocation2 + $0x10] sm:$0xf] %vm552_vm1, %v3797_v0  ;;  %s543_s0 = scalar_lea.vmem %s4564_s29, %s4561_s26  ;;  %3396 = vmatprep.subr.mxu0 %v615_v1  ;;  %v613_v5 = vld [vmem:[%s4565_s19 + $0x10] sm:$0xff]  ;;  %v612_v6 = vld [vmem:[%s4565_s19 + $0x8] sm:$0xff]  ;;  %v611_v7 = vld [vmem:[%s4565_s19] sm:$0xff]  ;;  %vm608_vm4 = vcmask 261120   ;;  %3410 = vmatpush3.msra.mxu1 %v768_v34 }
  0x10   : > { %v554_v2 = vld [vmem:[%s543_s0] sm:$0xff]  ;;  %v555_v3 = vld [vmem:[%s543_s0 + $0x8] sm:$0xff]  ;;  %3397 = vmatpush3.msra.mxu0 %v615_v1  ;;  %s3798_s0 = smov 16   ;;  %vm623_vm5 = vcmask 326656   ;;  %v766_v36 = vld [vmem:[%s4545_s3 + $0x38] sm:$0xff]  ;;  %vm753_vm6 = vcmask 392192  }
  0x11   : > { %557 = vst.msk [vmem:[#allocation2 + $0x2] sm:$0xff] %vm556_vm2, %v554_v2  ;;  %558 = vst.msk [vmem:[#allocation2 + $0xa] sm:$0xff] %vm556_vm2, %v555_v3  ;;  %3398 = vmatprep.subr.mxu0 %v614_v4  ;;  %v767_v35 = vld [vmem:[%s4545_s3 + $0x40] sm:$0xff]  ;;  %v765_v39 = vld [vmem:[%s4545_s3 + $0x30] sm:$0xff]  ;;  %vm756_vm7 = vcmask 523264   ;;  %vm776_vm8 = vcmask 654336  }
  0x12   : > { %3399 = vmatpush3.msra.mxu0 %v614_v4  ;;  %3411 = vmatprep.subr.mxu1 %v767_v35  ;;  %v3207_v37 = vld [vmem:[%s4544_s2] ss:$0 sm:$0xff]  ;;  %v764_v41 = vld [vmem:[%s4545_s3 + $0x28] sm:$0xff]  ;;  %v762_v45 = vld [vmem:[%s4545_s3 + $0x18] sm:$0xff]  ;;  %vm3804_vm9 = vmmov 0   ;;  %vm1206_vm10 = vcmask 253952  }
  0x13   : > { %3400 = vmatprep.subr.mxu0 %v613_v5  ;;  %3412 = vmatpush3.msra.mxu1 %v767_v35  ;;  %v763_v44 = vld [vmem:[%s4545_s3 + $0x20] sm:$0xff]  ;;  %v761_v46 = vld [vmem:[%s4545_s3 + $0x10] sm:$0xff]  ;;  %v760_v48 = vld [vmem:[%s4545_s3 + $0x8] sm:$0xff]  ;;  %vm1314_vm11 = vcmask 254977   ;;  %vm1536_vm12 = vcmask 257027   ;;  %vm1758_vm13 = vcmask 259077  }
  0x14   : > { %3401 = vmatpush3.msra.mxu0 %v613_v5  ;;  %3413 = vmatprep.subr.mxu1 %v766_v36  ;;  %v759_v49 = vld [vmem:[%s4545_s3] sm:$0xff]  ;;  %vm1980_vm14 = vcmask 261127   ;;  %vm1425_vm15 = vcmask 256002   ;;  %vm1869_vm1 = vcmask 260102  }
  0x15   : > { %3402 = vmatprep.subr.mxu0 %v612_v6  ;;  %3414 = vmatpush3.msra.mxu1 %v766_v36 }
  0x16   : > { %3403 = vmatpush3.msra.mxu0 %v612_v6  ;;  %3415 = vmatprep.subr.mxu1 %v765_v39 }
  0x17   : > { %3404 = vmatprep.subr.mxu0 %v611_v7  ;;  %3416 = vmatpush3.msra.mxu1 %v765_v39 }
  0x18   : > { %v563_v8 = vld [vmem:[#allocation2 + $0x2] sm:$0xff]  ;;  %v564_v10 = vld [vmem:[#allocation2 + $0xa] sm:$0xff]  ;;  %3405 = vmatpush3.msra.mxu0 %v611_v7  ;;  %3417 = vmatprep.subr.mxu1 %v764_v41 }
  0x19   : > { %v561_v9 = vld [vmem:[#allocation2 + $0x1] sm:$0xff]  ;;  %579 = vrot.lane.b32.xlu1 %v563_v8, %s3798_s0  ;;  %v562_v11 = vld [vmem:[#allocation2 + $0x9] sm:$0xff]  ;;  %3418 = vmatpush3.msra.mxu1 %v764_v41 }
  0x1a   : > { %571 = vrot.lane.b32.xlu0 %v561_v9, %s3799_s30  ;;  %v566_v12 = vld [vmem:[#allocation2 + $0xb] sm:$0xff]  ;;  %v565_v13 = vld [vmem:[#allocation2 + $0x3] sm:$0xff]  ;;  %3419 = vmatprep.subr.mxu1 %v763_v44 }
  0x1b   : > { %v568_v14 = vld [vmem:[#allocation2 + $0xc] sm:$0xff]  ;;  %v567_v15 = vld [vmem:[#allocation2 + $0x4] sm:$0xff]  ;;  %3420 = vmatpush3.msra.mxu1 %v763_v44 }
  0x1c   : > { %v559_v20 = vld [vmem:[#allocation2] sm:$0xff]  ;;  %v560_v21 = vld [vmem:[#allocation2 + $0x8] sm:$0xff]  ;;  %3421 = vmatprep.subr.mxu1 %v762_v45 }
  0x1d   : > { %581 = vrot.lane.b32.xlu1 %v564_v10, %s3798_s0  ;;  %3422 = vmatpush3.msra.mxu1 %v762_v45 }
  0x1e   : > { %573 = vrot.lane.b32.xlu0 %v562_v11, %s3799_s30  ;;  %3423 = vmatprep.subr.mxu1 %v761_v46 }
  0x1f   : > { %3424 = vmatpush3.msra.mxu1 %v761_v46 }
  0x20   : > { %3425 = vmatprep.subr.mxu1 %v760_v48 }
  0x21   : > { %589 = vrot.lane.b32.xlu1 %v566_v12, %s3800_s18  ;;  %3426 = vmatpush3.msra.mxu1 %v760_v48  ;;  %v919_v12 = vld [vmem:[%s4547_s5 + $0x48] sm:$0xff] }
  0x22   : > { %587 = vrot.lane.b32.xlu0 %v565_v13, %s3800_s18  ;;  %3427 = vmatprep.subr.mxu1 %v759_v49  ;;  %v918_v13 = vld [vmem:[%s4547_s5 + $0x40] sm:$0xff]  ;;  %s3805_s18 = smov 96  }
  0x23   : > { %3428 = vmatpush3.msra.mxu1 %v759_v49  ;;  %3432 = vmatprep.subr.mxu0 %v919_v12 }
  0x25   : > { %597 = vrot.lane.b32.xlu1 %v568_v14, %s3801_s1  ;;  %v917_v14 = vld [vmem:[%s4547_s5 + $0x38] sm:$0xff] }
  0x26   : > { %595 = vrot.lane.b32.xlu0 %v567_v15, %s3801_s1  ;;  %v3210_v15 = vld [vmem:[%s4546_s4] ss:$0 sm:$0xff] }
  0x8b   : > { %v580_v16 = vpop.permute.xlu1 %579 }
  0x8c   : > { %v572_v17 = vpop.permute.xlu0 %571 }
  0x8d   : > { %v601_v22 = vsel %vm556_vm2, %v559_v20, %v572_v17  ;;  %v916_v17 = vld [vmem:[%s4547_s5 + $0x30] sm:$0xff] }
  0x8e   : > { %v603_v27 = vsel %vm549_vm0, %v601_v22, %v580_v16  ;;  %v914_v22 = vld [vmem:[%s4547_s5 + $0x20] sm:$0xff] }
  0x8f   : > { %v582_v18 = vpop.permute.xlu1 %581 }
  0x90   : > { %v574_v19 = vpop.permute.xlu0 %573 }
  0x91   : > { %v602_v23 = vsel %vm556_vm2, %v560_v21, %v574_v19  ;;  %v915_v19 = vld [vmem:[%s4547_s5 + $0x28] sm:$0xff]  ;;  %vm3140_vm2 = vcmask 31744  }
  0x92   : > { %v604_v26 = vsel %vm549_vm0, %v602_v23, %v582_v18  ;;  %v913_v23 = vld [vmem:[%s4547_s5 + $0x18] sm:$0xff] }
  0x93   : > { %v590_v24 = vpop.permute.xlu1 %589 }
  0x94   : > { %v588_v25 = vpop.permute.xlu0 %587  ;;  %v607_v28 = vsel %vm605_vm3, %v604_v26, %v590_v24  ;;  %v912_v24 = vld [vmem:[%s4547_s5 + $0x10] sm:$0xff]  ;;  %v911_v26 = vld [vmem:[%s4547_s5 + $0x8] sm:$0xff] }
  0x95   : > { %v606_v29 = vsel %vm605_vm3, %v603_v27, %v588_v25 }
  0x97   : > { %v598_v30 = vpop.permute.xlu1 %597 }
  0x98   : > { %v596_v31 = vpop.permute.xlu0 %595  ;;  %v610_v32 = vsel %vm608_vm4, %v607_v28, %v598_v30 }
  0x99   : > { %v609_v33 = vsel %vm608_vm4, %v606_v29, %v596_v31  ;;  %v910_v29 = vld [vmem:[%s4547_s5] sm:$0xff] }
  0x9a   : > { %3406 = vmatprep.mubr.msk.f32.mxu0 %vm623_vm5, %v609_v33 }
  0x9b   : > { %3407 = vmatmul.mubr.msk.f32.vlgmr.msra.gmra.mxu0 %vm623_vm5, %v610_v32 }
  0x9c   : > { %3433 = vmatpush3.msra.mxu0 %v919_v12 }
  0x9d   : > { %3434 = vmatprep.subr.mxu0 %v918_v13 }
  0x9e   : > { %3435 = vmatpush3.msra.mxu0 %v918_v13 }
  0x9f   : > { %3436 = vmatprep.subr.mxu0 %v917_v14 }
  0xa0   : > { %3437 = vmatpush3.msra.mxu0 %v917_v14 }
  0xa1   : > { %3438 = vmatprep.subr.mxu0 %v916_v17 }
  0xa2   : > { %3439 = vmatpush3.msra.mxu0 %v916_v17 }
  0xa3   : > { %3440 = vmatprep.subr.mxu0 %v915_v19 }
  0xa4   : > { %3441 = vmatpush3.msra.mxu0 %v915_v19 }
  0xa5   : > { %3442 = vmatprep.subr.mxu0 %v914_v22 }
  0xa6   : > { %3443 = vmatpush3.msra.mxu0 %v914_v22 }
  0xa7   : > { %3444 = vmatprep.subr.mxu0 %v913_v23 }
  0xa8   : > { %3445 = vmatpush3.msra.mxu0 %v913_v23 }
  0xa9   : > { %3446 = vmatprep.subr.mxu0 %v912_v24 }
  0xaa   : > { %3447 = vmatpush3.msra.mxu0 %v912_v24 }
  0xab   : > { %3448 = vmatprep.subr.mxu0 %v911_v26 }
  0xac   : > { %3449 = vmatpush3.msra.mxu0 %v911_v26 }
  0xad   : > { %3450 = vmatprep.subr.mxu0 %v910_v29 }
  0xae   : > { %3451 = vmatpush3.msra.mxu0 %v910_v29 }
  0xaf   : > { %3473 = vmatprep.subr.mxu0 %v3797_v0 }
 0x15b   : > { %v3408_v38 = vpop.f32.mrf.mxu0 }
 0x15c   : > { %v702_v40 = vadd.f32 %v3408_v38, %v3207_v37 }
 0x15d   : > { %v696_v42 = vpop.f32.mrf.mxu0 }
 0x15e   : > { %706 = vst.msk [vmem:[#allocation2 + $0xa] sm:$0xff] %vm549_vm0, %v702_v40  ;;  %v697_v43 = vadd.f32 %v3207_v37, %v696_v42 }
 0x160   : > { %705 = vst.msk [vmem:[#allocation2 + $0x2] sm:$0xff] %vm549_vm0, %v697_v43 }
 0x165   : > { %v712_v47 = vld [vmem:[#allocation2 + $0xa] sm:$0xff] }
 0x166   : > { %729 = vrot.lane.b32.xlu1 %v712_v47, %s3801_s1  ;;  %v714_v51 = vld [vmem:[#allocation2 + $0xb] sm:$0xff] }
 0x167   : > { %v709_v50 = vld [vmem:[#allocation2 + $0x1] sm:$0xff]  ;;  %v710_v53 = vld [vmem:[#allocation2 + $0x9] sm:$0xff] }
 0x168   : > { %719 = vrot.lane.b32.xlu0 %v709_v50, %s3798_s0  ;;  %v711_v52 = vld [vmem:[#allocation2 + $0x2] sm:$0xff]  ;;  %v716_v55 = vld [vmem:[#allocation2 + $0xc] sm:$0xff] }
 0x169   : > { %v713_v54 = vld [vmem:[#allocation2 + $0x3] sm:$0xff] }
 0x16a   : > { %737 = vrot.lane.b32.xlu1 %v714_v51, %s3802_s27  ;;  %v715_v56 = vld [vmem:[#allocation2 + $0x4] sm:$0xff] }
 0x16b   : > { %v708_v62 = vld [vmem:[#allocation2 + $0x8] sm:$0xff]  ;;  %v707_v3 = vld [vmem:[#allocation2] sm:$0xff] }
 0x16c   : > { %727 = vrot.lane.b32.xlu0 %v711_v52, %s3801_s1 }
 0x16e   : > { %721 = vrot.lane.b32.xlu1 %v710_v53, %s3798_s0  ;;  %v1009_v53 = vld [vmem:[%s4549_s7 + $0x8] sm:$0xff] }
 0x16f   : > { %3455 = vmatprep.subr.mxu1 %v1009_v53 }
 0x170   : > { %735 = vrot.lane.b32.xlu0 %v713_v54, %s3802_s27  ;;  %v1008_v54 = vld [vmem:[%s4549_s7] sm:$0xff] }
 0x172   : > { %745 = vrot.lane.b32.xlu1 %v716_v55, %s3803_s28  ;;  %v4061_v55 = vld [vmem:[%s4550_s8 + $0x18] sm:$0xff] }
 0x174   : > { %743 = vrot.lane.b32.xlu0 %v715_v56, %s3803_s28  ;;  %v4067_v56 = vld [vmem:[%s4550_s8 + $0x10] sm:$0xff] }
 0x1d8   : > { %v730_v57 = vpop.permute.xlu1 %729 }
 0x1da   : > { %v720_v58 = vpop.permute.xlu0 %719 }
 0x1db   : > { %v749_v4 = vsel %vm549_vm0, %v707_v3, %v720_v58  ;;  %v4081_v58 = vld [vmem:[%s4550_s8] sm:$0xff] }
 0x1dc   : > { %v738_v59 = vpop.permute.xlu1 %737 }
 0x1de   : > { %v728_v60 = vpop.permute.xlu0 %727 }
 0x1df   : > { %v751_v5 = vsel %vm608_vm4, %v749_v4, %v728_v60  ;;  %v3213_v60 = vld [vmem:[%s4548_s6] ss:$0 sm:$0xff] }
 0x1e0   : > { %v722_v61 = vpop.permute.xlu1 %721 }
 0x1e1   : > { %v750_v63 = vsel %vm549_vm0, %v708_v62, %v722_v61 }
 0x1e2   : > { %v752_v1 = vsel %vm608_vm4, %v750_v63, %v730_v57  ;;  %v736_v2 = vpop.permute.xlu0 %735  ;;  %v4074_v57 = vld [vmem:[%s4550_s8 + $0x8] sm:$0xff] }
 0x1e3   : > { %v755_v7 = vsel %vm753_vm6, %v752_v1, %v738_v59  ;;  %v754_v8 = vsel %vm753_vm6, %v751_v5, %v736_v2  ;;  %v3216_v1 = vld [vmem:[%s4551_s9] ss:$0 sm:$0xff] }
 0x1e4   : > { %v746_v6 = vpop.permute.xlu1 %745  ;;  %v4122_v5 = vld [vmem:[%s4552_s10] sm:$0x1] }
 0x1e5   : > { %v758_v11 = vsel %vm756_vm7, %v755_v7, %v746_v6 }
 0x1e6   : > { %v744_v9 = vpop.permute.xlu0 %743 }
 0x1e7   : > { %v757_v10 = vsel %vm756_vm7, %v754_v8, %v744_v9 }
 0x1e8   : > { %3429 = vmatprep.mubr.msk.f32.mxu1 %vm776_vm8, %v757_v10 }
 0x1e9   : > { %3430 = vmatmul.mubr.msk.f32.vlgmr.msra.gmra.mxu1 %vm776_vm8, %v758_v11 }
 0x1ea   : > { %3456 = vmatpush3.msra.mxu1 %v1009_v53 }
 0x1eb   : > { %3457 = vmatprep.subr.mxu1 %v1008_v54 }
 0x1ec   : > { %3458 = vmatpush3.msra.mxu1 %v1008_v54 }
 0x1ed   : > { %3462 = vmatprep.subr.mxu1 %v3797_v0 }
 0x2a9   : > { %v3431_v16 = vpop.f32.mrf.mxu1 }
 0x2aa   : > { %v855_v18 = vadd.f32 %v3431_v16, %v3210_v15 }
 0x2ab   : > { %v849_v20 = vpop.f32.mrf.mxu1 }
 0x2ac   : > { %859 = vst.msk [vmem:[#allocation2 + $0xa] sm:$0xff] %vm549_vm0, %v855_v18  ;;  %v850_v21 = vadd.f32 %v3210_v15, %v849_v20 }
 0x2ae   : > { %858 = vst.msk [vmem:[#allocation2 + $0x2] sm:$0xff] %vm549_vm0, %v850_v21 }
 0x2b3   : > { %v865_v25 = vld [vmem:[#allocation2 + $0xa] sm:$0xff] }
 0x2b4   : > { %882 = vrot.lane.b32.xlu1 %v865_v25, %s3801_s1  ;;  %v867_v28 = vld [vmem:[#allocation2 + $0xb] sm:$0xff] }
 0x2b5   : > { %v862_v27 = vld [vmem:[#allocation2 + $0x1] sm:$0xff]  ;;  %v863_v31 = vld [vmem:[#allocation2 + $0x9] sm:$0xff] }
 0x2b6   : > { %872 = vrot.lane.b32.xlu0 %v862_v27, %s3798_s0  ;;  %v864_v30 = vld [vmem:[#allocation2 + $0x2] sm:$0xff]  ;;  %v869_v33 = vld [vmem:[#allocation2 + $0xc] sm:$0xff] }
 0x2b7   : > { %v866_v32 = vld [vmem:[#allocation2 + $0x3] sm:$0xff] }
 0x2b8   : > { %890 = vrot.lane.b32.xlu1 %v867_v28, %s3802_s27  ;;  %v868_v34 = vld [vmem:[#allocation2 + $0x4] sm:$0xff] }
 0x2b9   : > { %v861_v40 = vld [vmem:[#allocation2 + $0x8] sm:$0xff]  ;;  %v860_v44 = vld [vmem:[#allocation2] sm:$0xff] }
 0x2ba   : > { %880 = vrot.lane.b32.xlu0 %v864_v30, %s3801_s1 }
 0x2bc   : > { %874 = vrot.lane.b32.xlu1 %v863_v31, %s3798_s0 }
 0x2be   : > { %888 = vrot.lane.b32.xlu0 %v866_v32, %s3802_s27  ;;  %s4566_s27 = sshll.u32 %s4568_s25, 4 }
 0x2bf   : > { %s548_s23 = scalar_lea.vmem %s4559_s17, %s4566_s27 }
 0x2c0   : > { %898 = vrot.lane.b32.xlu1 %v869_v33, %s3803_s28 }
 0x2c2   : > { %896 = vrot.lane.b32.xlu0 %v868_v34, %s3803_s28 }
 0x326   : > { %v883_v35 = vpop.permute.xlu1 %882 }
 0x328   : > { %v873_v36 = vpop.permute.xlu0 %872 }
 0x329   : > { %v902_v45 = vsel %vm549_vm0, %v860_v44, %v873_v36 }
 0x32a   : > { %v891_v37 = vpop.permute.xlu1 %890 }
 0x32c   : > { %v881_v38 = vpop.permute.xlu0 %880 }
 0x32d   : > { %v904_v46 = vsel %vm608_vm4, %v902_v45, %v881_v38 }
 0x32e   : > { %v875_v39 = vpop.permute.xlu1 %874 }
 0x32f   : > { %v903_v41 = vsel %vm549_vm0, %v861_v40, %v875_v39 }
 0x330   : > { %v905_v42 = vsel %vm608_vm4, %v903_v41, %v883_v35  ;;  %v889_v43 = vpop.permute.xlu0 %888 }
 0x331   : > { %v907_v48 = vsel %vm753_vm6, %v905_v42, %v891_v37  ;;  %v906_v49 = vsel %vm753_vm6, %v904_v46, %v889_v43 }
 0x332   : > { %v899_v47 = vpop.permute.xlu1 %898 }
 0x333   : > { %v909_v52 = vsel %vm756_vm7, %v907_v48, %v899_v47 }
 0x334   : > { %v897_v50 = vpop.permute.xlu0 %896 }
 0x335   : > { %v908_v51 = vsel %vm756_vm7, %v906_v49, %v897_v50 }
 0x336   : > { %3452 = vmatprep.mubr.msk.f32.mxu0 %vm776_vm8, %v908_v51 }
 0x337   : > { %3453 = vmatmul.mubr.msk.f32.vlgmr.msra.gmra.mxu0 %vm776_vm8, %v909_v52 }
 0x338   : > { %3474 = vmatpush3.msra.mxu0 %v4061_v55  ;;  %3481 = vmatprep.mubr.msk.f32.mxu0 %vm3804_vm9, %v3797_v0 }
 0x339   : > { %3475 = vmatprep.subr.mxu0 %v3797_v0 }
 0x33a   : > { %3476 = vmatpush3.msra.mxu0 %v4067_v56 }
 0x33b   : > { %3477 = vmatprep.subr.mxu0 %v3797_v0 }
 0x33c   : > { %3478 = vmatpush3.msra.mxu0 %v4074_v57 }
 0x33d   : > { %3479 = vmatprep.subr.mxu0 %v3797_v0 }
 0x33e   : > { %3480 = vmatpush3.msra.mxu0 %v4081_v58 }
 0x33f   : > { %3495 = vmatprep.subr.mxu0 %v3797_v0 }
 0x3f7   : > { %v3454_v59 = vpop.f32.mrf.mxu0 }
 0x3f8   : > { %v1005_v63 = vadd.f32 %v3454_v59, %v3213_v60 }
 0x3f9   : > { %v999_v61 = vpop.f32.mrf.mxu0 }
 0x3fa   : > { %v1000_v62 = vadd.f32 %v3213_v60, %v999_v61 }
 0x3fc   : > { %3459 = vmatprep.mubr.msk.f32.mxu1 %vm549_vm0, %v1000_v62 }
 0x3fd   : > { %3460 = vmatmul.mubr.msk.f32.vlgmr.msra.gmra.mxu1 %vm549_vm0, %v1005_v63  ;;  %vm1647_vm0 = vcmask 258052  }
 0x3fe   : > { %3463 = vmatpush3.msra.mxu1 %v4061_v55  ;;  %3470 = vmatprep.mubr.msk.f32.mxu1 %vm3804_vm9, %v3797_v0 }
 0x3ff   : > { %3464 = vmatprep.subr.mxu1 %v3797_v0 }
 0x400   : > { %3465 = vmatpush3.msra.mxu1 %v4067_v56 }
 0x401   : > { %3466 = vmatprep.subr.mxu1 %v3797_v0 }
 0x402   : > { %3467 = vmatpush3.msra.mxu1 %v4074_v57 }
 0x403   : > { %3468 = vmatprep.subr.mxu1 %v3797_v0 }
 0x404   : > { %3469 = vmatpush3.msra.mxu1 %v4081_v58 }
 0x405   : > { %3471 = vmatmul.mubr.f32.vlgmr.msra.gmra.mxu1 %v3797_v0  ;;  %3484 = vmatprep.subr.mxu1 %v3797_v0 }
 0x406   : > { %3485 = vmatpush3.msra.mxu1 %v4061_v55  ;;  %3492 = vmatprep.mubr.msk.f32.mxu1 %vm3804_vm9, %v3797_v0 }
 0x407   : > { %3486 = vmatprep.subr.mxu1 %v3797_v0 }
 0x408   : > { %3487 = vmatpush3.msra.mxu1 %v4067_v56 }
 0x409   : > { %3488 = vmatprep.subr.mxu1 %v3797_v0 }
 0x40a   : > { %3489 = vmatpush3.msra.mxu1 %v4074_v57 }
 0x40b   : > { %3490 = vmatprep.subr.mxu1 %v3797_v0 }
 0x40c   : > { %3491 = vmatpush3.msra.mxu1 %v4081_v58 }
 0x40d   : > { %3506 = vmatprep.subr.mxu1 %v3797_v0 }
 0x4bd   : > { %v3461_v2 = vpop.f32.mrf.mxu1 }
 0x4be   : > { %v4117_v3 = vadd.f32 %v3461_v2, %v3216_v1 }
 0x4bf   : > { %v1089_v4 = vpop.f32.mrf.mxu1 }
 0x4c0   : > { %v4126_v9 = vadd.f32 %v3216_v1, %v1089_v4 }
 0x4c5   : > { %v1172_v6 = vpop.f32.mrf.mxu1 }
 0x4c6   : > { %v1173_v7 = vadd.f32 %v1172_v6, %v4122_v5 }
 0x4c7   : > { %v3472_v8 = vpop.f32.mrf.mxu1 }
 0x4c8   : > { %1184 = vrot.lane.b32.xlu0 %v1173_v7, %s3803_s28  ;;  %v1176_v10 = vadd.f32 %v1173_v7, %v4126_v9 }
 0x4ca   : > { %v3219_v11 = vmul.f32 -1.442695, %v1176_v10 }
 0x4cc   : > { %3688 = vpow2.f32 %v3219_v11 }
 0x4d9   : > { %v3689_v12 = vpop.eup %3688 }
 0x4da   : > { %v1180_v13 = vadd.f32 1.0, %v3689_v12 }
 0x4dc   : > { %3690 = vrcp.f32 %v1180_v13 }
 0x4e9   : > { %v3691_v14 = vpop.eup %3690 }
 0x4ea   : > { %v1194_v20 = vsub.f32 1.0, %v3691_v14  ;;  %v1200_v22 = vmul.f32 0.0, %v3691_v14 }
 0x53a   : > { %v1185_v15 = vpop.permute.xlu0 %1184 }
 0x53b   : > { %v1187_v16 = vmul.f32 %v3691_v14, %v1185_v15 }
 0x53d   : > { %1189 = vrot.lane.b32.xlu1 %v1187_v16, %s3803_s28 }
 0x5af   : > { %v1190_v17 = vpop.permute.xlu1 %1189 }
 0x5b0   : > { %v1192_v18 = vadd.f32 %v1190_v17, %v4126_v9 }
 0x5b2   : > { %3692 = vtanh.f32 %v1192_v18 }
 0x5bf   : > { %v3693_v19 = vpop.eup %3692 }
 0x5c0   : > { %1196 = vrot.lane.b32.xlu0 %v3693_v19, %s3805_s18 }
 0x632   : > { %v1197_v21 = vpop.permute.xlu0 %1196 }
 0x633   : > { %v1199_v23 = vmul.f32 %v1197_v21, %v1194_v20 }
 0x635   : > { %v1201_v24 = vadd.f32 %v1200_v22, %v1199_v23 }
 0x637   : > { %1203 = vrot.lane.b32.xlu1 %v1201_v24, %s3805_s18  ;;  %v1306_v40 = vrot.slane %v1201_v24, 7 }
 0x6a9   : > { %v1204_v25 = vpop.permute.xlu1 %1203 }
 0x6aa   : > { %1207 = vst.msk [vmem:[#allocation3] sm:$0x1] %vm1206_vm10, %v1204_v25  ;;  %3482 = vmatmul.mubr.msk.f32.vlgmr.msra.gmra.mxu0 %vm608_vm4, %v1204_v25 }
 0x6ab   : > { %3496 = vmatpush3.msra.mxu0 %v4061_v55  ;;  %3503 = vmatprep.mubr.msk.f32.mxu0 %vm3804_vm9, %v3797_v0 }
 0x6ac   : > { %3497 = vmatprep.subr.mxu0 %v3797_v0 }
 0x6ad   : > { %3498 = vmatpush3.msra.mxu0 %v4067_v56 }
 0x6ae   : > { %3499 = vmatprep.subr.mxu0 %v3797_v0 }
 0x6af   : > { %3500 = vmatpush3.msra.mxu0 %v4074_v57 }
 0x6b0   : > { %3501 = vmatprep.subr.mxu0 %v3797_v0 }
 0x6b1   : > { %3502 = vmatpush3.msra.mxu0 %v4081_v58 }
 0x6b2   : > { %3517 = vmatprep.subr.mxu0 %v3797_v0 }
 0x76a   : > { %v1276_v26 = vpop.f32.mrf.mxu0 }
 0x76b   : > { %v1277_v27 = vadd.f32 %v1276_v26, %v4122_v5 }
 0x76c   : > { %v3483_v28 = vpop.f32.mrf.mxu0 }
 0x76d   : > { %v1281_v29 = vrot.slane %v1277_v27, 7 }
 0x76f   : > { %1290 = vrot.lane.b32.xlu0 %v1281_v29, %s3803_s28  ;;  %v1283_v30 = vadd.f32 %v1281_v29, %v4126_v9 }
 0x771   : > { %v3221_v31 = vmul.f32 -1.442695, %v1283_v30 }
 0x773   : > { %3694 = vpow2.f32 %v3221_v31 }
 0x780   : > { %v3695_v32 = vpop.eup %3694 }
 0x781   : > { %v1287_v33 = vadd.f32 1.0, %v3695_v32 }
 0x783   : > { %3696 = vrcp.f32 %v1287_v33 }
 0x790   : > { %v3697_v34 = vpop.eup %3696 }
 0x791   : > { %v1300_v41 = vsub.f32 1.0, %v3697_v34  ;;  %v1308_v44 = vmul.f32 %v3697_v34, %v1306_v40 }
 0x7e1   : > { %v1291_v35 = vpop.permute.xlu0 %1290 }
 0x7e2   : > { %v1293_v36 = vmul.f32 %v3697_v34, %v1291_v35 }
 0x7e4   : > { %1295 = vrot.lane.b32.xlu1 %v1293_v36, %s3803_s28 }
 0x856   : > { %v1296_v37 = vpop.permute.xlu1 %1295 }
 0x857   : > { %v1298_v38 = vadd.f32 %v1296_v37, %v4126_v9 }
 0x859   : > { %3698 = vtanh.f32 %v1298_v38 }
 0x866   : > { %v3699_v39 = vpop.eup %3698 }
 0x867   : > { %1302 = vrot.lane.b32.xlu0 %v3699_v39, %s3805_s18 }
 0x8d9   : > { %v1303_v42 = vpop.permute.xlu0 %1302 }
 0x8da   : > { %v1305_v43 = vmul.f32 %v1303_v42, %v1300_v41 }
 0x8dc   : > { %v4151_v45 = vadd.f32 %v1308_v44, %v1305_v43 }
 0x8de   : > { %v1316_v46 = vrot.slane %v4151_v45, 1  ;;  %v1417_v6 = vrot.slane %v4151_v45, 7 }
 0x8e0   : > { %1317 = vrot.lane.b32.xlu1 %v1316_v46, %s3805_s18 }
 0x952   : > { %v1318_v47 = vpop.permute.xlu1 %1317 }
 0x953   : > { %3493 = vmatmul.mubr.msk.f32.vlgmr.msra.gmra.mxu1 %vm608_vm4, %v1318_v47 }
 0x954   : > { %3507 = vmatpush3.msra.mxu1 %v4061_v55  ;;  %3514 = vmatprep.mubr.msk.f32.mxu1 %vm3804_vm9, %v3797_v0 }
 0x955   : > { %3508 = vmatprep.subr.mxu1 %v3797_v0 }
 0x956   : > { %3509 = vmatpush3.msra.mxu1 %v4067_v56 }
 0x957   : > { %3510 = vmatprep.subr.mxu1 %v3797_v0 }
 0x958   : > { %3511 = vmatpush3.msra.mxu1 %v4074_v57 }
 0x959   : > { %3512 = vmatprep.subr.mxu1 %v3797_v0 }
 0x95a   : > { %3513 = vmatpush3.msra.mxu1 %v4081_v58 }
 0x95b   : > { %3528 = vmatprep.subr.mxu1 %v3797_v0 }
 0xa13   : > { %v1387_v48 = vpop.f32.mrf.mxu1 }
 0xa14   : > { %v1388_v49 = vadd.f32 %v1387_v48, %v4122_v5 }
 0xa15   : > { %v3494_v50 = vpop.f32.mrf.mxu1 }
 0xa16   : > { %v1392_v51 = vrot.slane %v1388_v49, 6 }
 0xa18   : > { %1401 = vrot.lane.b32.xlu0 %v1392_v51, %s3803_s28  ;;  %v1394_v52 = vadd.f32 %v1392_v51, %v4126_v9 }
 0xa1a   : > { %v3223_v53 = vmul.f32 -1.442695, %v1394_v52 }
 0xa1c   : > { %3700 = vpow2.f32 %v3223_v53 }
 0xa29   : > { %v3701_v54 = vpop.eup %3700 }
 0xa2a   : > { %v1398_v59 = vadd.f32 1.0, %v3701_v54 }
 0xa2c   : > { %3702 = vrcp.f32 %v1398_v59 }
 0xa39   : > { %v3703_v60 = vpop.eup %3702 }
 0xa3a   : > { %v1411_v4 = vsub.f32 1.0, %v3703_v60  ;;  %v1419_v8 = vmul.f32 %v3703_v60, %v1417_v6 }
 0xa8a   : > { %v1402_v61 = vpop.permute.xlu0 %1401 }
 0xa8b   : > { %v1404_v62 = vmul.f32 %v3703_v60, %v1402_v61 }
 0xa8d   : > { %1406 = vrot.lane.b32.xlu1 %v1404_v62, %s3803_s28 }
 0xaff   : > { %v1407_v63 = vpop.permute.xlu1 %1406 }
 0xb00   : > { %v1409_v1 = vadd.f32 %v1407_v63, %v4126_v9 }
 0xb02   : > { %3704 = vtanh.f32 %v1409_v1 }
 0xb0f   : > { %v3705_v2 = vpop.eup %3704 }
 0xb10   : > { %1413 = vrot.lane.b32.xlu0 %v3705_v2, %s3805_s18 }
 0xb82   : > { %v1414_v7 = vpop.permute.xlu0 %1413 }
 0xb83   : > { %v1416_v10 = vmul.f32 %v1414_v7, %v1411_v4 }
 0xb85   : > { %v4173_v11 = vadd.f32 %v1419_v8, %v1416_v10 }
 0xb87   : > { %v1427_v12 = vrot.slane %v4173_v11, 2  ;;  %v1528_v29 = vrot.slane %v4173_v11, 7 }
 0xb89   : > { %1428 = vrot.lane.b32.xlu1 %v1427_v12, %s3805_s18 }
 0xbfb   : > { %v1429_v13 = vpop.permute.xlu1 %1428 }
 0xbfc   : > { %3504 = vmatmul.mubr.msk.f32.vlgmr.msra.gmra.mxu0 %vm608_vm4, %v1429_v13 }
 0xbfd   : > { %3518 = vmatpush3.msra.mxu0 %v4061_v55  ;;  %3525 = vmatprep.mubr.msk.f32.mxu0 %vm3804_vm9, %v3797_v0 }
 0xbfe   : > { %3519 = vmatprep.subr.mxu0 %v3797_v0 }
 0xbff   : > { %3520 = vmatpush3.msra.mxu0 %v4067_v56 }
 0xc00   : > { %3521 = vmatprep.subr.mxu0 %v3797_v0 }
 0xc01   : > { %3522 = vmatpush3.msra.mxu0 %v4074_v57 }
 0xc02   : > { %3523 = vmatprep.subr.mxu0 %v3797_v0 }
 0xc03   : > { %3524 = vmatpush3.msra.mxu0 %v4081_v58 }
 0xc04   : > { %3539 = vmatprep.subr.mxu0 %v3797_v0 }
 0xcbc   : > { %v1498_v14 = vpop.f32.mrf.mxu0 }
 0xcbd   : > { %v1499_v15 = vadd.f32 %v1498_v14, %v4122_v5 }
 0xcbe   : > { %v3505_v16 = vpop.f32.mrf.mxu0 }
 0xcbf   : > { %v1503_v17 = vrot.slane %v1499_v15, 5 }
 0xcc1   : > { %1512 = vrot.lane.b32.xlu0 %v1503_v17, %s3803_s28  ;;  %v1505_v18 = vadd.f32 %v1503_v17, %v4126_v9 }
 0xcc3   : > { %v3225_v19 = vmul.f32 -1.442695, %v1505_v18 }
 0xcc5   : > { %3706 = vpow2.f32 %v3225_v19 }
 0xcd2   : > { %v3707_v20 = vpop.eup %3706 }
 0xcd3   : > { %v1509_v21 = vadd.f32 1.0, %v3707_v20 }
 0xcd5   : > { %3708 = vrcp.f32 %v1509_v21 }
 0xce2   : > { %v3709_v22 = vpop.eup %3708 }
 0xce3   : > { %v1522_v28 = vsub.f32 1.0, %v3709_v22  ;;  %v1530_v31 = vmul.f32 %v3709_v22, %v1528_v29 }
 0xd33   : > { %v1513_v23 = vpop.permute.xlu0 %1512 }
 0xd34   : > { %v1515_v24 = vmul.f32 %v3709_v22, %v1513_v23 }
 0xd36   : > { %1517 = vrot.lane.b32.xlu1 %v1515_v24, %s3803_s28 }
 0xda8   : > { %v1518_v25 = vpop.permute.xlu1 %1517 }
 0xda9   : > { %v1520_v26 = vadd.f32 %v1518_v25, %v4126_v9 }
 0xdab   : > { %3710 = vtanh.f32 %v1520_v26 }
 0xdb8   : > { %v3711_v27 = vpop.eup %3710 }
 0xdb9   : > { %1524 = vrot.lane.b32.xlu0 %v3711_v27, %s3805_s18 }
 0xe2b   : > { %v1525_v30 = vpop.permute.xlu0 %1524 }
 0xe2c   : > { %v1527_v32 = vmul.f32 %v1525_v30, %v1522_v28 }
 0xe2e   : > { %v4195_v33 = vadd.f32 %v1530_v31, %v1527_v32 }
 0xe30   : > { %v1538_v34 = vrot.slane %v4195_v33, 3  ;;  %v1639_v52 = vrot.slane %v4195_v33, 7 }
 0xe32   : > { %1539 = vrot.lane.b32.xlu1 %v1538_v34, %s3805_s18 }
 0xea4   : > { %v1540_v35 = vpop.permute.xlu1 %1539 }
 0xea5   : > { %3515 = vmatmul.mubr.msk.f32.vlgmr.msra.gmra.mxu1 %vm608_vm4, %v1540_v35 }
 0xea6   : > { %3529 = vmatpush3.msra.mxu1 %v4061_v55  ;;  %3536 = vmatprep.mubr.msk.f32.mxu1 %vm3804_vm9, %v3797_v0 }
 0xea7   : > { %3530 = vmatprep.subr.mxu1 %v3797_v0 }
 0xea8   : > { %3531 = vmatpush3.msra.mxu1 %v4067_v56 }
 0xea9   : > { %3532 = vmatprep.subr.mxu1 %v3797_v0 }
 0xeaa   : > { %3533 = vmatpush3.msra.mxu1 %v4074_v57 }
 0xeab   : > { %3534 = vmatprep.subr.mxu1 %v3797_v0 }
 0xeac   : > { %3535 = vmatpush3.msra.mxu1 %v4081_v58 }
 0xead   : > { %3550 = vmatprep.subr.mxu1 %v3797_v0 }
 0xf65   : > { %v1609_v36 = vpop.f32.mrf.mxu1 }
 0xf66   : > { %v1610_v37 = vadd.f32 %v1609_v36, %v4122_v5 }
 0xf67   : > { %v3516_v38 = vpop.f32.mrf.mxu1 }
 0xf68   : > { %v1614_v39 = vrot.slane %v1610_v37, 4 }
 0xf6a   : > { %1623 = vrot.lane.b32.xlu0 %v1614_v39, %s3803_s28  ;;  %v1616_v40 = vadd.f32 %v1614_v39, %v4126_v9 }
 0xf6c   : > { %v3227_v41 = vmul.f32 -1.442695, %v1616_v40 }
 0xf6e   : > { %3712 = vpow2.f32 %v3227_v41 }
 0xf7b   : > { %v3713_v42 = vpop.eup %3712 }
 0xf7c   : > { %v1620_v43 = vadd.f32 1.0, %v3713_v42 }
 0xf7e   : > { %3714 = vrcp.f32 %v1620_v43 }
 0xf8b   : > { %v3715_v44 = vpop.eup %3714 }
 0xf8c   : > { %v1633_v51 = vsub.f32 1.0, %v3715_v44  ;;  %v1641_v54 = vmul.f32 %v3715_v44, %v1639_v52 }
 0xfdc   : > { %v1624_v46 = vpop.permute.xlu0 %1623 }
 0xfdd   : > { %v1626_v47 = vmul.f32 %v3715_v44, %v1624_v46 }
 0xfdf   : > { %1628 = vrot.lane.b32.xlu1 %v1626_v47, %s3803_s28 }
0x1051   : > { %v1629_v48 = vpop.permute.xlu1 %1628 }
0x1052   : > { %v1631_v49 = vadd.f32 %v1629_v48, %v4126_v9 }
0x1054   : > { %3716 = vtanh.f32 %v1631_v49 }
0x1061   : > { %v3717_v50 = vpop.eup %3716 }
0x1062   : > { %1635 = vrot.lane.b32.xlu0 %v3717_v50, %s3805_s18 }
0x10d4   : > { %v1636_v53 = vpop.permute.xlu0 %1635 }
0x10d5   : > { %v1638_v59 = vmul.f32 %v1636_v53, %v1633_v51 }
0x10d7   : > { %v4217_v60 = vadd.f32 %v1641_v54, %v1638_v59 }
0x10d9   : > { %v1649_v61 = vrot.slane %v4217_v60, 4  ;;  %v1750_v19 = vrot.slane %v4217_v60, 7 }
0x10db   : > { %1650 = vrot.lane.b32.xlu1 %v1649_v61, %s3805_s18 }
0x114d   : > { %v1651_v62 = vpop.permute.xlu1 %1650 }
0x114e   : > { %3526 = vmatmul.mubr.msk.f32.vlgmr.msra.gmra.mxu0 %vm608_vm4, %v1651_v62 }
0x114f   : > { %3540 = vmatpush3.msra.mxu0 %v4061_v55  ;;  %3547 = vmatprep.mubr.msk.f32.mxu0 %vm3804_vm9, %v3797_v0 }
0x1150   : > { %3541 = vmatprep.subr.mxu0 %v3797_v0 }
0x1151   : > { %3542 = vmatpush3.msra.mxu0 %v4067_v56 }
0x1152   : > { %3543 = vmatprep.subr.mxu0 %v3797_v0 }
0x1153   : > { %3544 = vmatpush3.msra.mxu0 %v4074_v57 }
0x1154   : > { %3545 = vmatprep.subr.mxu0 %v3797_v0 }
0x1155   : > { %3546 = vmatpush3.msra.mxu0 %v4081_v58 }
0x1156   : > { %3561 = vmatprep.subr.mxu0 %v3797_v0 }
0x120e   : > { %v1720_v63 = vpop.f32.mrf.mxu0 }
0x120f   : > { %v1721_v1 = vadd.f32 %v1720_v63, %v4122_v5 }
0x1210   : > { %v3527_v2 = vpop.f32.mrf.mxu0 }
0x1211   : > { %v1725_v4 = vrot.slane %v1721_v1, 3 }
0x1213   : > { %1734 = vrot.lane.b32.xlu0 %v1725_v4, %s3803_s28  ;;  %v1727_v6 = vadd.f32 %v1725_v4, %v4126_v9 }
0x1215   : > { %v3229_v7 = vmul.f32 -1.442695, %v1727_v6 }
0x1217   : > { %3718 = vpow2.f32 %v3229_v7 }
0x1224   : > { %v3719_v8 = vpop.eup %3718 }
0x1225   : > { %v1731_v10 = vadd.f32 1.0, %v3719_v8 }
0x1227   : > { %3720 = vrcp.f32 %v1731_v10 }
0x1234   : > { %v3721_v12 = vpop.eup %3720 }
0x1235   : > { %v1744_v18 = vsub.f32 1.0, %v3721_v12  ;;  %v1752_v21 = vmul.f32 %v3721_v12, %v1750_v19 }
0x1285   : > { %v1735_v13 = vpop.permute.xlu0 %1734 }
0x1286   : > { %v1737_v14 = vmul.f32 %v3721_v12, %v1735_v13 }
0x1288   : > { %1739 = vrot.lane.b32.xlu1 %v1737_v14, %s3803_s28 }
0x12fa   : > { %v1740_v15 = vpop.permute.xlu1 %1739 }
0x12fb   : > { %v1742_v16 = vadd.f32 %v1740_v15, %v4126_v9 }
0x12fd   : > { %3722 = vtanh.f32 %v1742_v16 }
0x130a   : > { %v3723_v17 = vpop.eup %3722 }
0x130b   : > { %1746 = vrot.lane.b32.xlu0 %v3723_v17, %s3805_s18 }
0x137d   : > { %v1747_v20 = vpop.permute.xlu0 %1746 }
0x137e   : > { %v1749_v22 = vmul.f32 %v1747_v20, %v1744_v18 }
0x1380   : > { %v4239_v23 = vadd.f32 %v1752_v21, %v1749_v22 }
0x1382   : > { %v1760_v24 = vrot.slane %v4239_v23, 5  ;;  %v1861_v42 = vrot.slane %v4239_v23, 7 }
0x1384   : > { %1761 = vrot.lane.b32.xlu1 %v1760_v24, %s3805_s18 }
0x13f6   : > { %v1762_v25 = vpop.permute.xlu1 %1761 }
0x13f7   : > { %3537 = vmatmul.mubr.msk.f32.vlgmr.msra.gmra.mxu1 %vm608_vm4, %v1762_v25 }
0x13f8   : > { %3551 = vmatpush3.msra.mxu1 %v4061_v55  ;;  %3558 = vmatprep.mubr.msk.f32.mxu1 %vm3804_vm9, %v3797_v0 }
0x13f9   : > { %3552 = vmatprep.subr.mxu1 %v3797_v0 }
0x13fa   : > { %3553 = vmatpush3.msra.mxu1 %v4067_v56 }
0x13fb   : > { %3554 = vmatprep.subr.mxu1 %v3797_v0 }
0x13fc   : > { %3555 = vmatpush3.msra.mxu1 %v4074_v57 }
0x13fd   : > { %3556 = vmatprep.subr.mxu1 %v3797_v0 }
0x13fe   : > { %3557 = vmatpush3.msra.mxu1 %v4081_v58 }
0x13ff   : > { %3572 = vmatprep.subr.mxu1 %v3797_v0 }
0x14b7   : > { %v1831_v26 = vpop.f32.mrf.mxu1 }
0x14b8   : > { %v1832_v27 = vadd.f32 %v1831_v26, %v4122_v5 }
0x14b9   : > { %v3538_v28 = vpop.f32.mrf.mxu1 }
0x14ba   : > { %v1836_v29 = vrot.slane %v1832_v27, 2 }
0x14bc   : > { %1845 = vrot.lane.b32.xlu0 %v1836_v29, %s3803_s28  ;;  %v1838_v30 = vadd.f32 %v1836_v29, %v4126_v9 }
0x14be   : > { %v3231_v31 = vmul.f32 -1.442695, %v1838_v30 }
0x14c0   : > { %3724 = vpow2.f32 %v3231_v31 }
0x14cd   : > { %v3725_v32 = vpop.eup %3724 }
0x14ce   : > { %v1842_v34 = vadd.f32 1.0, %v3725_v32 }
0x14d0   : > { %3726 = vrcp.f32 %v1842_v34 }
0x14dd   : > { %v3727_v35 = vpop.eup %3726 }
0x14de   : > { %v1855_v41 = vsub.f32 1.0, %v3727_v35  ;;  %v1863_v44 = vmul.f32 %v3727_v35, %v1861_v42 }
0x152e   : > { %v1846_v36 = vpop.permute.xlu0 %1845 }
0x152f   : > { %v1848_v37 = vmul.f32 %v3727_v35, %v1846_v36 }
0x1531   : > { %1850 = vrot.lane.b32.xlu1 %v1848_v37, %s3803_s28 }
0x15a3   : > { %v1851_v38 = vpop.permute.xlu1 %1850 }
0x15a4   : > { %v1853_v39 = vadd.f32 %v1851_v38, %v4126_v9 }
0x15a6   : > { %3728 = vtanh.f32 %v1853_v39 }
0x15b3   : > { %v3729_v40 = vpop.eup %3728 }
0x15b4   : > { %1857 = vrot.lane.b32.xlu0 %v3729_v40, %s3805_s18 }
0x1626   : > { %v1858_v43 = vpop.permute.xlu0 %1857 }
0x1627   : > { %v1860_v46 = vmul.f32 %v1858_v43, %v1855_v41 }
0x1629   : > { %v4261_v47 = vadd.f32 %v1863_v44, %v1860_v46 }
0x162b   : > { %v1871_v48 = vrot.slane %v4261_v47, 6  ;;  %v1972_v10 = vrot.slane %v4261_v47, 7 }
0x162d   : > { %1872 = vrot.lane.b32.xlu1 %v1871_v48, %s3805_s18 }
0x169f   : > { %v1873_v49 = vpop.permute.xlu1 %1872 }
0x16a0   : > { %3548 = vmatmul.mubr.msk.f32.vlgmr.msra.gmra.mxu0 %vm608_vm4, %v1873_v49 }
0x16a1   : > { %3562 = vmatpush3.msra.mxu0 %v4061_v55  ;;  %3569 = vmatprep.mubr.msk.f32.mxu0 %vm3804_vm9, %v3797_v0 }
0x16a2   : > { %3563 = vmatprep.subr.mxu0 %v3797_v0 }
0x16a3   : > { %3564 = vmatpush3.msra.mxu0 %v4067_v56 }
0x16a4   : > { %3565 = vmatprep.subr.mxu0 %v3797_v0 }
0x16a5   : > { %3566 = vmatpush3.msra.mxu0 %v4074_v57 }
0x16a6   : > { %3567 = vmatprep.subr.mxu0 %v3797_v0 }
0x16a7   : > { %3568 = vmatpush3.msra.mxu0 %v4081_v58 }
0x16a8   : > { %3583 = vmatprep.subr.mxu0 %v3797_v0 }
0x1760   : > { %v1942_v50 = vpop.f32.mrf.mxu0 }
0x1761   : > { %v1943_v51 = vadd.f32 %v1942_v50, %v4122_v5 }
0x1762   : > { %v3549_v52 = vpop.f32.mrf.mxu0 }
0x1763   : > { %v1947_v53 = vrot.slane %v1943_v51, 1 }
0x1765   : > { %1956 = vrot.lane.b32.xlu0 %v1947_v53, %s3803_s28  ;;  %v1949_v54 = vadd.f32 %v1947_v53, %v4126_v9 }
0x1767   : > { %v3233_v59 = vmul.f32 -1.442695, %v1949_v54 }
0x1769   : > { %3730 = vpow2.f32 %v3233_v59 }
0x1776   : > { %v3731_v61 = vpop.eup %3730 }
0x1777   : > { %v1953_v62 = vadd.f32 1.0, %v3731_v61 }
0x1779   : > { %3732 = vrcp.f32 %v1953_v62 }
0x1786   : > { %v3733_v63 = vpop.eup %3732 }
0x1787   : > { %v1966_v8 = vsub.f32 1.0, %v3733_v63  ;;  %v1974_v13 = vmul.f32 %v3733_v63, %v1972_v10 }
0x17d7   : > { %v1957_v1 = vpop.permute.xlu0 %1956 }
0x17d8   : > { %v1959_v2 = vmul.f32 %v3733_v63, %v1957_v1 }
0x17da   : > { %1961 = vrot.lane.b32.xlu1 %v1959_v2, %s3803_s28 }
0x184c   : > { %v1962_v4 = vpop.permute.xlu1 %1961 }
0x184d   : > { %v1964_v6 = vadd.f32 %v1962_v4, %v4126_v9 }
0x184f   : > { %3734 = vtanh.f32 %v1964_v6 }
0x185c   : > { %v3735_v7 = vpop.eup %3734 }
0x185d   : > { %1968 = vrot.lane.b32.xlu0 %v3735_v7, %s3805_s18 }
0x18cf   : > { %v1969_v12 = vpop.permute.xlu0 %1968 }
0x18d0   : > { %v1971_v14 = vmul.f32 %v1969_v12, %v1966_v8 }
0x18d2   : > { %v4283_v15 = vadd.f32 %v1974_v13, %v1971_v14 }
0x18d4   : > { %v1982_v16 = vrot.slane %v4283_v15, 7 }
0x18d6   : > { %1983 = vrot.lane.b32.xlu1 %v1982_v16, %s3805_s18 }
0x1948   : > { %v1984_v17 = vpop.permute.xlu1 %1983 }
0x1949   : > { %3559 = vmatmul.mubr.msk.f32.vlgmr.msra.gmra.mxu1 %vm608_vm4, %v1984_v17 }
0x194a   : > { %3573 = vmatpush3.msra.mxu1 %v4061_v55  ;;  %3580 = vmatprep.mubr.msk.f32.mxu1 %vm3804_vm9, %v3797_v0 }
0x194b   : > { %3574 = vmatprep.subr.mxu1 %v3797_v0 }
0x194c   : > { %3575 = vmatpush3.msra.mxu1 %v4067_v56 }
0x194d   : > { %3576 = vmatprep.subr.mxu1 %v3797_v0 }
0x194e   : > { %3577 = vmatpush3.msra.mxu1 %v4074_v57 }
0x194f   : > { %3578 = vmatprep.subr.mxu1 %v3797_v0 }
0x1950   : > { %3579 = vmatpush3.msra.mxu1 %v4081_v58 }
0x1951   : > { %3594 = vmatprep.subr.mxu1 %v3797_v0 }
0x1a09   : > { %v2053_v9 = vpop.f32.mrf.mxu1 }
0x1a0a   : > { %v2054_v18 = vadd.f32 %v2053_v9, %v4122_v5 }
0x1a0b   : > { %v3560_v19 = vpop.f32.mrf.mxu1 }
0x1a0c   : > { %2065 = vrot.lane.b32.xlu0 %v2054_v18, %s3803_s28  ;;  %v2057_v20 = vadd.f32 %v2054_v18, %v4117_v3 }
0x1a0e   : > { %v3235_v21 = vmul.f32 -1.442695, %v2057_v20 }
0x1a10   : > { %3736 = vpow2.f32 %v3235_v21 }
0x1a1d   : > { %v3737_v22 = vpop.eup %3736 }
0x1a1e   : > { %v2061_v24 = vadd.f32 1.0, %v3737_v22 }
0x1a20   : > { %3738 = vrcp.f32 %v2061_v24 }
0x1a2d   : > { %v3739_v25 = vpop.eup %3738 }
0x1a2e   : > { %v2075_v31 = vsub.f32 1.0, %v3739_v25  ;;  %v2082_v34 = vmul.f32 %v3739_v25, %v1982_v16 }
0x1a7e   : > { %v2066_v26 = vpop.permute.xlu0 %2065 }
0x1a7f   : > { %v2068_v27 = vmul.f32 %v3739_v25, %v2066_v26 }
0x1a81   : > { %2070 = vrot.lane.b32.xlu1 %v2068_v27, %s3803_s28 }
0x1af3   : > { %v2071_v28 = vpop.permute.xlu1 %2070 }
0x1af4   : > { %v2073_v29 = vadd.f32 %v2071_v28, %v4117_v3 }
0x1af6   : > { %3740 = vtanh.f32 %v2073_v29 }
0x1b03   : > { %v3741_v30 = vpop.eup %3740 }
0x1b04   : > { %2077 = vrot.lane.b32.xlu0 %v3741_v30, %s3805_s18 }
0x1b76   : > { %v2078_v32 = vpop.permute.xlu0 %2077 }
0x1b77   : > { %v2080_v35 = vmul.f32 %v2078_v32, %v2075_v31 }
0x1b79   : > { %v2083_v36 = vadd.f32 %v2082_v34, %v2080_v35 }
0x1b7b   : > { %2085 = vrot.lane.b32.xlu1 %v2083_v36, %s3805_s18  ;;  %v2187_v54 = vrot.slane %v2083_v36, 7 }
0x1bed   : > { %v2086_v37 = vpop.permute.xlu1 %2085 }
0x1bee   : > { %2088 = vst.msk [vmem:[#allocation3 + $0x8] sm:$0x1] %vm1206_vm10, %v2086_v37  ;;  %3570 = vmatmul.mubr.msk.f32.vlgmr.msra.gmra.mxu0 %vm608_vm4, %v2086_v37 }
0x1bef   : > { %3584 = vmatpush3.msra.mxu0 %v4061_v55  ;;  %3591 = vmatprep.mubr.msk.f32.mxu0 %vm3804_vm9, %v3797_v0 }
0x1bf0   : > { %3585 = vmatprep.subr.mxu0 %v3797_v0 }
0x1bf1   : > { %3586 = vmatpush3.msra.mxu0 %v4067_v56 }
0x1bf2   : > { %3587 = vmatprep.subr.mxu0 %v3797_v0 }
0x1bf3   : > { %3588 = vmatpush3.msra.mxu0 %v4074_v57 }
0x1bf4   : > { %3589 = vmatprep.subr.mxu0 %v3797_v0 }
0x1bf5   : > { %3590 = vmatpush3.msra.mxu0 %v4081_v58 }
0x1bf6   : > { %3605 = vmatprep.subr.mxu0 %v3797_v0 }
0x1cae   : > { %v2157_v38 = vpop.f32.mrf.mxu0 }
0x1caf   : > { %v2158_v39 = vadd.f32 %v2157_v38, %v4122_v5 }
0x1cb0   : > { %v3571_v40 = vpop.f32.mrf.mxu0 }
0x1cb1   : > { %v2162_v41 = vrot.slane %v2158_v39, 7 }
0x1cb3   : > { %2171 = vrot.lane.b32.xlu0 %v2162_v41, %s3803_s28  ;;  %v2164_v42 = vadd.f32 %v2162_v41, %v4117_v3 }
0x1cb5   : > { %v3237_v43 = vmul.f32 -1.442695, %v2164_v42 }
0x1cb7   : > { %3742 = vpow2.f32 %v3237_v43 }
0x1cc4   : > { %v3743_v44 = vpop.eup %3742 }
0x1cc5   : > { %v2168_v46 = vadd.f32 1.0, %v3743_v44 }
0x1cc7   : > { %3744 = vrcp.f32 %v2168_v46 }
0x1cd4   : > { %v3745_v48 = vpop.eup %3744 }
0x1cd5   : > { %v2181_v59 = vsub.f32 1.0, %v3745_v48  ;;  %v2189_v63 = vmul.f32 %v3745_v48, %v2187_v54 }
0x1d25   : > { %v2172_v49 = vpop.permute.xlu0 %2171 }
0x1d26   : > { %v2174_v50 = vmul.f32 %v3745_v48, %v2172_v49 }
0x1d28   : > { %2176 = vrot.lane.b32.xlu1 %v2174_v50, %s3803_s28 }
0x1d9a   : > { %v2177_v51 = vpop.permute.xlu1 %2176 }
0x1d9b   : > { %v2179_v52 = vadd.f32 %v2177_v51, %v4117_v3 }
0x1d9d   : > { %3746 = vtanh.f32 %v2179_v52 }
0x1daa   : > { %v3747_v53 = vpop.eup %3746 }
0x1dab   : > { %2183 = vrot.lane.b32.xlu0 %v3747_v53, %s3805_s18 }
0x1e1d   : > { %v2184_v61 = vpop.permute.xlu0 %2183 }
0x1e1e   : > { %v2186_v62 = vmul.f32 %v2184_v61, %v2181_v59 }
0x1e20   : > { %v4323_v1 = vadd.f32 %v2189_v63, %v2186_v62 }
0x1e22   : > { %v2196_v2 = vrot.slane %v4323_v1, 1  ;;  %v2297_v24 = vrot.slane %v4323_v1, 7 }
0x1e24   : > { %2197 = vrot.lane.b32.xlu1 %v2196_v2, %s3805_s18 }
0x1e96   : > { %v2198_v4 = vpop.permute.xlu1 %2197 }
0x1e97   : > { %3581 = vmatmul.mubr.msk.f32.vlgmr.msra.gmra.mxu1 %vm608_vm4, %v2198_v4 }
0x1e98   : > { %3595 = vmatpush3.msra.mxu1 %v4061_v55  ;;  %3602 = vmatprep.mubr.msk.f32.mxu1 %vm3804_vm9, %v3797_v0 }
0x1e99   : > { %3596 = vmatprep.subr.mxu1 %v3797_v0 }
0x1e9a   : > { %3597 = vmatpush3.msra.mxu1 %v4067_v56 }
0x1e9b   : > { %3598 = vmatprep.subr.mxu1 %v3797_v0 }
0x1e9c   : > { %3599 = vmatpush3.msra.mxu1 %v4074_v57 }
0x1e9d   : > { %3600 = vmatprep.subr.mxu1 %v3797_v0 }
0x1e9e   : > { %3601 = vmatpush3.msra.mxu1 %v4081_v58 }
0x1e9f   : > { %3616 = vmatprep.subr.mxu1 %v3797_v0 }
0x1f57   : > { %v2267_v6 = vpop.f32.mrf.mxu1 }
0x1f58   : > { %v2268_v7 = vadd.f32 %v2267_v6, %v4122_v5 }
0x1f59   : > { %v3582_v8 = vpop.f32.mrf.mxu1 }
0x1f5a   : > { %v2272_v10 = vrot.slane %v2268_v7, 6 }
0x1f5c   : > { %2281 = vrot.lane.b32.xlu0 %v2272_v10, %s3803_s28  ;;  %v2274_v12 = vadd.f32 %v2272_v10, %v4117_v3 }
0x1f5e   : > { %v3239_v13 = vmul.f32 -1.442695, %v2274_v12 }
0x1f60   : > { %3748 = vpow2.f32 %v3239_v13 }
0x1f6d   : > { %v3749_v14 = vpop.eup %3748 }
0x1f6e   : > { %v2278_v16 = vadd.f32 1.0, %v3749_v14 }
0x1f70   : > { %3750 = vrcp.f32 %v2278_v16 }
0x1f7d   : > { %v3751_v17 = vpop.eup %3750 }
0x1f7e   : > { %v2291_v22 = vsub.f32 1.0, %v3751_v17  ;;  %v2299_v26 = vmul.f32 %v3751_v17, %v2297_v24  ;;  %v3786_v24 = vld [vmem:[%s4550_s8 + $0x8] sm:$0xff] }
0x1fce   : > { %v2282_v9 = vpop.permute.xlu0 %2281 }
0x1fcf   : > { %v2284_v18 = vmul.f32 %v3751_v17, %v2282_v9 }
0x1fd1   : > { %2286 = vrot.lane.b32.xlu1 %v2284_v18, %s3803_s28 }
0x2043   : > { %v2287_v19 = vpop.permute.xlu1 %2286 }
0x2044   : > { %v2289_v20 = vadd.f32 %v2287_v19, %v4117_v3 }
0x2046   : > { %3752 = vtanh.f32 %v2289_v20 }
0x2053   : > { %v3753_v21 = vpop.eup %3752 }
0x2054   : > { %2293 = vrot.lane.b32.xlu0 %v3753_v21, %s3805_s18  ;;  %v3784_v21 = vld [vmem:[%s4550_s8 + $0x18] sm:$0xff] }
0x20c6   : > { %v2294_v25 = vpop.permute.xlu0 %2293 }
0x20c7   : > { %v2296_v27 = vmul.f32 %v2294_v25, %v2291_v22  ;;  %v3785_v22 = vld [vmem:[%s4550_s8 + $0x10] sm:$0xff]  ;;  %v3787_v25 = vld [vmem:[%s4550_s8] sm:$0xff] }
0x20c9   : > { %v4345_v28 = vadd.f32 %v2299_v26, %v2296_v27 }
0x20cb   : > { %v2306_v29 = vrot.slane %v4345_v28, 2  ;;  %v2407_v49 = vrot.slane %v4345_v28, 7 }
0x20cd   : > { %2307 = vrot.lane.b32.xlu1 %v2306_v29, %s3805_s18 }
0x213f   : > { %v2308_v30 = vpop.permute.xlu1 %2307 }
0x2140   : > { %3592 = vmatmul.mubr.msk.f32.vlgmr.msra.gmra.mxu0 %vm608_vm4, %v2308_v30 }
0x2141   : > { %3606 = vmatpush3.msra.mxu0 %v4061_v55  ;;  %3613 = vmatprep.mubr.msk.f32.mxu0 %vm3804_vm9, %v3797_v0 }
0x2142   : > { %3607 = vmatprep.subr.mxu0 %v3797_v0 }
0x2143   : > { %3608 = vmatpush3.msra.mxu0 %v4067_v56 }
0x2144   : > { %3609 = vmatprep.subr.mxu0 %v3797_v0 }
0x2145   : > { %3610 = vmatpush3.msra.mxu0 %v4074_v57 }
0x2146   : > { %3611 = vmatprep.subr.mxu0 %v3797_v0 }
0x2147   : > { %3612 = vmatpush3.msra.mxu0 %v4081_v58 }
0x2148   : > { %3627 = vmatprep.subr.mxu0 %v3797_v0 }
0x2200   : > { %v2377_v31 = vpop.f32.mrf.mxu0 }
0x2201   : > { %v2378_v32 = vadd.f32 %v2377_v31, %v4122_v5 }
0x2202   : > { %v3593_v34 = vpop.f32.mrf.mxu0 }
0x2203   : > { %v2382_v35 = vrot.slane %v2378_v32, 5 }
0x2205   : > { %2391 = vrot.lane.b32.xlu0 %v2382_v35, %s3803_s28  ;;  %v2384_v36 = vadd.f32 %v2382_v35, %v4117_v3 }
0x2207   : > { %v3241_v37 = vmul.f32 -1.442695, %v2384_v36 }
0x2209   : > { %3754 = vpow2.f32 %v3241_v37 }
0x2216   : > { %v3755_v38 = vpop.eup %3754 }
0x2217   : > { %v2388_v39 = vadd.f32 1.0, %v3755_v38 }
0x2219   : > { %3756 = vrcp.f32 %v2388_v39 }
0x2226   : > { %v3757_v40 = vpop.eup %3756 }
0x2227   : > { %v2401_v48 = vsub.f32 1.0, %v3757_v40  ;;  %v2409_v51 = vmul.f32 %v3757_v40, %v2407_v49 }
0x2277   : > { %v2392_v41 = vpop.permute.xlu0 %2391 }
0x2278   : > { %v2394_v42 = vmul.f32 %v3757_v40, %v2392_v41 }
0x227a   : > { %2396 = vrot.lane.b32.xlu1 %v2394_v42, %s3803_s28 }
0x22ec   : > { %v2397_v43 = vpop.permute.xlu1 %2396 }
0x22ed   : > { %v2399_v44 = vadd.f32 %v2397_v43, %v4117_v3 }
0x22ef   : > { %3758 = vtanh.f32 %v2399_v44 }
0x22fc   : > { %v3759_v46 = vpop.eup %3758 }
0x22fd   : > { %2403 = vrot.lane.b32.xlu0 %v3759_v46, %s3805_s18 }
0x236f   : > { %v2404_v50 = vpop.permute.xlu0 %2403 }
0x2370   : > { %v2406_v52 = vmul.f32 %v2404_v50, %v2401_v48 }
0x2372   : > { %v4367_v53 = vadd.f32 %v2409_v51, %v2406_v52  ;;  %v3788_v51 = vld [vmem:[%s4552_s10] sm:$0x1] }
0x2374   : > { %v2416_v54 = vrot.slane %v4367_v53, 3  ;;  %v2517_v14 = vrot.slane %v4367_v53, 7 }
0x2376   : > { %2417 = vrot.lane.b32.xlu1 %v2416_v54, %s3805_s18 }
0x23e8   : > { %v2418_v59 = vpop.permute.xlu1 %2417 }
0x23e9   : > { %3603 = vmatmul.mubr.msk.f32.vlgmr.msra.gmra.mxu1 %vm608_vm4, %v2418_v59 }
0x23ea   : > { %3617 = vmatpush3.msra.mxu1 %v4061_v55  ;;  %3624 = vmatprep.mubr.msk.f32.mxu1 %vm3804_vm9, %v3797_v0 }
0x23eb   : > { %3618 = vmatprep.subr.mxu1 %v3797_v0 }
0x23ec   : > { %3619 = vmatpush3.msra.mxu1 %v4067_v56 }
0x23ed   : > { %3620 = vmatprep.subr.mxu1 %v3797_v0 }
0x23ee   : > { %3621 = vmatpush3.msra.mxu1 %v4074_v57 }
0x23ef   : > { %3622 = vmatprep.subr.mxu1 %v3797_v0 }
0x23f0   : > { %3623 = vmatpush3.msra.mxu1 %v4081_v58 }
0x24a9   : > { %v2487_v61 = vpop.f32.mrf.mxu1 }
0x24aa   : > { %v2488_v62 = vadd.f32 %v2487_v61, %v4122_v5 }
0x24ab   : > { %v3604_v63 = vpop.f32.mrf.mxu1 }
0x24ac   : > { %v2492_v55 = vrot.slane %v2488_v62, 4 }
0x24ae   : > { %2501 = vrot.lane.b32.xlu0 %v2492_v55, %s3803_s28  ;;  %v2494_v2 = vadd.f32 %v2492_v55, %v4117_v3 }
0x24b0   : > { %v3243_v4 = vmul.f32 -1.442695, %v2494_v2 }
0x24b2   : > { %3760 = vpow2.f32 %v3243_v4 }
0x24bf   : > { %v3761_v56 = vpop.eup %3760 }
0x24c0   : > { %v2498_v6 = vadd.f32 1.0, %v3761_v56 }
0x24c2   : > { %3762 = vrcp.f32 %v2498_v6 }
0x24cf   : > { %v3763_v7 = vpop.eup %3762 }
0x24d0   : > { %v2511_v13 = vsub.f32 1.0, %v3763_v7  ;;  %v2519_v17 = vmul.f32 %v3763_v7, %v2517_v14 }
0x2520   : > { %v2502_v57 = vpop.permute.xlu0 %2501 }
0x2521   : > { %v2504_v8 = vmul.f32 %v3763_v7, %v2502_v57 }
0x2523   : > { %2506 = vrot.lane.b32.xlu1 %v2504_v8, %s3803_s28 }
0x2595   : > { %v2507_v58 = vpop.permute.xlu1 %2506 }
0x2596   : > { %v2509_v10 = vadd.f32 %v2507_v58, %v4117_v3 }
0x2598   : > { %3764 = vtanh.f32 %v2509_v10 }
0x25a5   : > { %v3765_v12 = vpop.eup %3764 }
0x25a6   : > { %2513 = vrot.lane.b32.xlu0 %v3765_v12, %s3805_s18 }
0x2618   : > { %v2514_v16 = vpop.permute.xlu0 %2513 }
0x2619   : > { %v2516_v9 = vmul.f32 %v2514_v16, %v2511_v13 }
0x261b   : > { %v4388_v18 = vadd.f32 %v2519_v17, %v2516_v9 }
0x261d   : > { %v2526_v19 = vrot.slane %v4388_v18, 4  ;;  %v2627_v41 = vrot.slane %v4388_v18, 7 }
0x261f   : > { %2527 = vrot.lane.b32.xlu1 %v2526_v19, %s3805_s18 }
0x2691   : > { %v2528_v20 = vpop.permute.xlu1 %2527 }
0x2692   : > { %3614 = vmatmul.mubr.msk.f32.vlgmr.msra.gmra.mxu0 %vm608_vm4, %v2528_v20 }
0x2693   : > { %3628 = vmatpush3.msra.mxu0 %v3784_v21  ;;  %3635 = vmatprep.mubr.msk.f32.mxu0 %vm3804_vm9, %v3797_v0 }
0x2694   : > { %3629 = vmatprep.subr.mxu0 %v3797_v0 }
0x2695   : > { %3630 = vmatpush3.msra.mxu0 %v3785_v22 }
0x2696   : > { %3631 = vmatprep.subr.mxu0 %v3797_v0 }
0x2697   : > { %3632 = vmatpush3.msra.mxu0 %v3786_v24 }
0x2698   : > { %3633 = vmatprep.subr.mxu0 %v3797_v0 }
0x2699   : > { %3634 = vmatpush3.msra.mxu0 %v3787_v25 }
0x2752   : > { %v2597_v26 = vpop.f32.mrf.mxu0 }
0x2753   : > { %v2598_v27 = vadd.f32 %v2597_v26, %v4122_v5 }
0x2754   : > { %v3615_v29 = vpop.f32.mrf.mxu0 }
0x2755   : > { %v2602_v30 = vrot.slane %v2598_v27, 3 }
0x2757   : > { %2611 = vrot.lane.b32.xlu0 %v2602_v30, %s3803_s28  ;;  %v2604_v31 = vadd.f32 %v2602_v30, %v4117_v3 }
0x2759   : > { %v3245_v32 = vmul.f32 -1.442695, %v2604_v31 }
0x275b   : > { %3766 = vpow2.f32 %v3245_v32 }
0x2768   : > { %v3767_v34 = vpop.eup %3766 }
0x2769   : > { %v2608_v35 = vadd.f32 1.0, %v3767_v34 }
0x276b   : > { %3768 = vrcp.f32 %v2608_v35 }
0x2778   : > { %v3769_v0 = vpop.eup %3768 }
0x2779   : > { %v2621_v40 = vsub.f32 1.0, %v3769_v0  ;;  %v2629_v43 = vmul.f32 %v3769_v0, %v2627_v41 }
0x27c9   : > { %v2612_v36 = vpop.permute.xlu0 %2611 }
0x27ca   : > { %v2614_v37 = vmul.f32 %v3769_v0, %v2612_v36 }
0x27cc   : > { %2616 = vrot.lane.b32.xlu1 %v2614_v37, %s3803_s28 }
0x283e   : > { %v2617_v38 = vpop.permute.xlu1 %2616 }
0x283f   : > { %v2619_v39 = vadd.f32 %v2617_v38, %v4117_v3 }
0x2841   : > { %3770 = vtanh.f32 %v2619_v39 }
0x284e   : > { %v3771_v5 = vpop.eup %3770 }
0x284f   : > { %2623 = vrot.lane.b32.xlu0 %v3771_v5, %s3805_s18 }
0x28c1   : > { %v2624_v42 = vpop.permute.xlu0 %2623 }
0x28c2   : > { %v2626_v44 = vmul.f32 %v2624_v42, %v2621_v40 }
0x28c4   : > { %v4417_v46 = vadd.f32 %v2629_v43, %v2626_v44 }
0x28c6   : > { %v2636_v48 = vrot.slane %v4417_v46, 5  ;;  %v2737_v58 = vrot.slane %v4417_v46, 7 }
0x28c8   : > { %2637 = vrot.lane.b32.xlu1 %v2636_v48, %s3805_s18 }
0x293a   : > { %v2638_v49 = vpop.permute.xlu1 %2637 }
0x293b   : > { %3625 = vmatmul.mubr.msk.f32.vlgmr.msra.gmra.mxu1 %vm608_vm4, %v2638_v49 }
0x29fb   : > { %v2707_v50 = vpop.f32.mrf.mxu1 }
0x29fc   : > { %v2708_v52 = vadd.f32 %v3788_v51, %v2707_v50 }
0x29fd   : > { %v3626_v54 = vpop.f32.mrf.mxu1 }
0x29fe   : > { %v2712_v59 = vrot.slane %v2708_v52, 2  ;;  %v2956_v52 = vld [vmem:[%s4555_s13 + $0x10] sm:$0xff]  ;;  %v2955_v54 = vld [vmem:[%s4555_s13 + $0x8] sm:$0xff] }
0x2a00   : > { %2721 = vrot.lane.b32.xlu0 %v2712_v59, %s3803_s28  ;;  %v2714_v61 = vadd.f32 %v2712_v59, %v4117_v3  ;;  %v2954_v59 = vld [vmem:[%s4555_s13] sm:$0xff] }
0x2a02   : > { %v3247_v62 = vmul.f32 -1.442695, %v2714_v61  ;;  %v3250_v61 = vld [vmem:[%s4554_s12] ss:$0 sm:$0xff] }
0x2a04   : > { %3772 = vpow2.f32 %v3247_v62 }
0x2a11   : > { %v3773_v63 = vpop.eup %3772 }
0x2a12   : > { %v2718_v55 = vadd.f32 1.0, %v3773_v63 }
0x2a14   : > { %3774 = vrcp.f32 %v2718_v55 }
0x2a21   : > { %v3775_v2 = vpop.eup %3774 }
0x2a22   : > { %v2731_v8 = vsub.f32 1.0, %v3775_v2  ;;  %v2739_v12 = vmul.f32 %v3775_v2, %v2737_v58  ;;  %v3253_v58 = vld [vmem:[%s4556_s14] ss:$0 sm:$0xff] }
0x2a72   : > { %v2722_v4 = vpop.permute.xlu0 %2721 }
0x2a73   : > { %v2724_v56 = vmul.f32 %v3775_v2, %v2722_v4 }
0x2a75   : > { %2726 = vrot.lane.b32.xlu1 %v2724_v56, %s3803_s28 }
0x2ae7   : > { %v2727_v6 = vpop.permute.xlu1 %2726 }
0x2ae8   : > { %v2729_v7 = vadd.f32 %v2727_v6, %v4117_v3  ;;  %v3051_v6 = vld [vmem:[%s4557_s15 + $0x18] sm:$0xff] }
0x2aea   : > { %3776 = vtanh.f32 %v2729_v7  ;;  %v3050_v7 = vld [vmem:[%s4557_s15 + $0x10] sm:$0xff] }
0x2af7   : > { %v3777_v57 = vpop.eup %3776 }
0x2af8   : > { %2733 = vrot.lane.b32.xlu0 %v3777_v57, %s3805_s18  ;;  %v3049_v57 = vld [vmem:[%s4557_s15 + $0x8] sm:$0xff] }
0x2b6a   : > { %v2734_v10 = vpop.permute.xlu0 %2733 }
0x2b6b   : > { %v2736_v13 = vmul.f32 %v2734_v10, %v2731_v8  ;;  %v3048_v8 = vld [vmem:[%s4557_s15] sm:$0xff] }
0x2b6d   : > { %v4431_v14 = vadd.f32 %v2739_v12, %v2736_v13 }
0x2b6f   : > { %v2746_v16 = vrot.slane %v4431_v14, 6  ;;  %v2847_v35 = vrot.slane %v4431_v14, 7 }
0x2b71   : > { %2747 = vrot.lane.b32.xlu1 %v2746_v16, %s3805_s18 }
0x2be3   : > { %v2748_v17 = vpop.permute.xlu1 %2747 }
0x2be4   : > { %3636 = vmatmul.mubr.msk.f32.vlgmr.msra.gmra.mxu0 %vm608_vm4, %v2748_v17 }
0x2ca4   : > { %v2817_v9 = vpop.f32.mrf.mxu0 }
0x2ca5   : > { %v2818_v19 = vadd.f32 %v3788_v51, %v2817_v9  ;;  %v2957_v51 = vld [vmem:[%s4555_s13 + $0x18] sm:$0xff]  ;;  %v3256_v9 = vld [vmem:[%s4558_s16] ss:$0 sm:$0xff] }
0x2ca6   : > { %v3637_v20 = vpop.f32.mrf.mxu0  ;;  %3649 = vmatprep.subr.mxu0 %v2957_v51 }
0x2ca7   : > { %v2822_v21 = vrot.slane %v2818_v19, 1  ;;  %3650 = vmatpush3.msra.mxu0 %v2957_v51 }
0x2ca8   : > { %3651 = vmatprep.subr.mxu0 %v2956_v52 }
0x2ca9   : > { %2831 = vrot.lane.b32.xlu0 %v2822_v21, %s3803_s28  ;;  %v2824_v22 = vadd.f32 %v2822_v21, %v4117_v3  ;;  %3652 = vmatpush3.msra.mxu0 %v2956_v52 }
0x2caa   : > { %3653 = vmatprep.subr.mxu0 %v2955_v54 }
0x2cab   : > { %v3249_v24 = vmul.f32 -1.442695, %v2824_v22  ;;  %3654 = vmatpush3.msra.mxu0 %v2955_v54 }
0x2cac   : > { %3655 = vmatprep.subr.mxu0 %v2954_v59 }
0x2cad   : > { %3778 = vpow2.f32 %v3249_v24  ;;  %3656 = vmatpush3.msra.mxu0 %v2954_v59 }
0x2cba   : > { %v3779_v25 = vpop.eup %3778 }
0x2cbb   : > { %v2828_v26 = vadd.f32 1.0, %v3779_v25 }
0x2cbd   : > { %3780 = vrcp.f32 %v2828_v26 }
0x2cca   : > { %v3781_v27 = vpop.eup %3780 }
0x2ccb   : > { %v2849_v36 = vmul.f32 %v3781_v27, %v2847_v35 }
0x2d1b   : > { %v2832_v29 = vpop.permute.xlu0 %2831 }
0x2d1c   : > { %v2834_v30 = vmul.f32 %v3781_v27, %v2832_v29 }
0x2d1e   : > { %2836 = vrot.lane.b32.xlu1 %v2834_v30, %s3803_s28 }
0x2d22   : > { %1311 = vrot.lane.b32.xlu1 %v4151_v45, %s3805_s18 }
0x2d26   : > { %1533 = vrot.lane.b32.xlu1 %v4195_v33, %s3805_s18 }
0x2d2a   : > { %1755 = vrot.lane.b32.xlu1 %v4239_v23, %s3805_s18 }
0x2d2e   : > { %1977 = vrot.lane.b32.xlu1 %v4283_v15, %s3805_s18 }
0x2d32   : > { %2302 = vrot.lane.b32.xlu1 %v4345_v28, %s3805_s18 }
0x2d36   : > { %2522 = vrot.lane.b32.xlu1 %v4388_v18, %s3805_s18 }
0x2d3a   : > { %2742 = vrot.lane.b32.xlu1 %v4431_v14, %s3805_s18 }
0x2d90   : > { %v2837_v31 = vpop.permute.xlu1 %2836 }
0x2d91   : > { %v2839_v45 = vadd.f32 %v2837_v31, %v4117_v3 }
0x2d93   : > { %3782 = vtanh.f32 %v2839_v45 }
0x2d94   : > { %v1312_v33 = vpop.permute.xlu1 %1311 }
0x2d95   : > { %1315 = vst.msk [vmem:[#allocation3] sm:$0x2] %vm1314_vm11, %v1312_v33 }
0x2d98   : > { %v1534_v23 = vpop.permute.xlu1 %1533 }
0x2d99   : > { %1537 = vst.msk [vmem:[#allocation3] sm:$0x8] %vm1536_vm12, %v1534_v23 }
0x2d9c   : > { %v1756_v15 = vpop.permute.xlu1 %1755 }
0x2d9d   : > { %1759 = vst.msk [vmem:[#allocation3] sm:$0x20] %vm1758_vm13, %v1756_v15 }
0x2da0   : > { %v3783_v28 = vpop.eup %3782  ;;  %v1978_v18 = vpop.permute.xlu1 %1977 }
0x2da1   : > { %1981 = vst.msk [vmem:[#allocation3] sm:$0x80] %vm1980_vm14, %v1978_v18  ;;  %2843 = vrot.lane.b32.xlu0 %v3783_v28, %s3805_s18 }
0x2da4   : > { %v2303_v3 = vpop.permute.xlu1 %2302 }
0x2da5   : > { %2305 = vst.msk [vmem:[#allocation3 + $0x8] sm:$0x4] %vm1425_vm15, %v2303_v3  ;;  %1422 = vrot.lane.b32.xlu0 %v4173_v11, %s3805_s18  ;;  %v2863_v11 = vld [vmem:[%s4553_s11 + $0x18] sm:$0xff] }
0x2da6   : > { %3638 = vmatprep.subr.mxu1 %v2863_v11 }
0x2da7   : > { %3639 = vmatpush3.msra.mxu1 %v2863_v11 }
0x2da8   : > { %v2523_v32 = vpop.permute.xlu1 %2522 }
0x2da9   : > { %2525 = vst.msk [vmem:[#allocation3 + $0x8] sm:$0x10] %vm1647_vm0, %v2523_v32  ;;  %1644 = vrot.lane.b32.xlu0 %v4217_v60, %s3805_s18  ;;  %v2862_v60 = vld [vmem:[%s4553_s11 + $0x10] sm:$0xff] }
0x2daa   : > { %3640 = vmatprep.subr.mxu1 %v2862_v60 }
0x2dab   : > { %3641 = vmatpush3.msra.mxu1 %v2862_v60 }
0x2dac   : > { %v2743_v34 = vpop.permute.xlu1 %2742 }
0x2dad   : > { %2745 = vst.msk [vmem:[#allocation3 + $0x8] sm:$0x40] %vm1869_vm1, %v2743_v34  ;;  %1866 = vrot.lane.b32.xlu0 %v4261_v47, %s3805_s18  ;;  %v2861_v47 = vld [vmem:[%s4553_s11 + $0x8] sm:$0xff] }
0x2dae   : > { %3642 = vmatprep.subr.mxu1 %v2861_v47 }
0x2daf   : > { %3643 = vmatpush3.msra.mxu1 %v2861_v47 }
0x2db1   : > { %2192 = vrot.lane.b32.xlu0 %v4323_v1, %s3805_s18  ;;  %v2860_v1 = vld [vmem:[%s4553_s11] sm:$0xff] }
0x2db2   : > { %3644 = vmatprep.subr.mxu1 %v2860_v1 }
0x2db3   : > { %3645 = vmatpush3.msra.mxu1 %v2860_v1 }
0x2db4   : > { %3660 = vmatprep.subr.mxu1 %v3051_v6 }
0x2db5   : > { %2412 = vrot.lane.b32.xlu0 %v4367_v53, %s3805_s18  ;;  %v2841_v53 = vsub.f32 1.0, %v3781_v27 }
0x2db9   : > { %2632 = vrot.lane.b32.xlu0 %v4417_v46, %s3805_s18 }
0x2e13   : > { %v2844_v0 = vpop.permute.xlu0 %2843 }
0x2e14   : > { %v2846_v37 = vmul.f32 %v2844_v0, %v2841_v53 }
0x2e16   : > { %v2850_v38 = vadd.f32 %v2849_v36, %v2846_v37 }
0x2e17   : > { %v1423_v39 = vpop.permute.xlu0 %1422 }
0x2e18   : > { %1426 = vst.msk [vmem:[#allocation3] sm:$0x4] %vm1425_vm15, %v1423_v39  ;;  %2852 = vrot.lane.b32.xlu0 %v2850_v38, %s3805_s18 }
0x2e1b   : > { %v1645_v5 = vpop.permute.xlu0 %1644 }
0x2e1c   : > { %1648 = vst.msk [vmem:[#allocation3] sm:$0x10] %vm1647_vm0, %v1645_v5 }
0x2e1f   : > { %v1867_v40 = vpop.permute.xlu0 %1866 }
0x2e20   : > { %1870 = vst.msk [vmem:[#allocation3] sm:$0x40] %vm1869_vm1, %v1867_v40 }
0x2e23   : > { %v2193_v41 = vpop.permute.xlu0 %2192 }
0x2e24   : > { %2195 = vst.msk [vmem:[#allocation3 + $0x8] sm:$0x2] %vm1314_vm11, %v2193_v41 }
0x2e27   : > { %v2413_v42 = vpop.permute.xlu0 %2412  ;;  %v2856_v43 = vld [vmem:[#allocation3] sm:$0xff] }
0x2e28   : > { %2415 = vst.msk [vmem:[#allocation3 + $0x8] sm:$0x8] %vm1536_vm12, %v2413_v42  ;;  %v2858_v44 = vmax.f32 %v2856_v43, 0.0 }
0x2e2a   : > { %3646 = vmatprep.mubr.msk.f32.mxu1 %vm608_vm4, %v2858_v44 }
0x2e2b   : > { %v2633_v46 = vpop.permute.xlu0 %2632 }
0x2e2c   : > { %2635 = vst.msk [vmem:[#allocation3 + $0x8] sm:$0x20] %vm1758_vm13, %v2633_v46 }
0x2e8a   : > { %v2853_v48 = vpop.permute.xlu0 %2852 }
0x2e8b   : > { %2855 = vst.msk [vmem:[#allocation3 + $0x8] sm:$0x80] %vm1980_vm14, %v2853_v48 }
0x2e92   : > { %v2857_v49 = vld [vmem:[#allocation3 + $0x8] sm:$0xff] }
0x2e93   : > { %v2859_v50 = vmax.f32 %v2857_v49, 0.0 }
0x2e95   : > { %3647 = vmatmul.mubr.msk.f32.vlgmr.msra.gmra.mxu1 %vm608_vm4, %v2859_v50 }
0x2e96   : > { %3661 = vmatpush3.msra.mxu1 %v3051_v6 }
0x2e97   : > { %3662 = vmatprep.subr.mxu1 %v3050_v7 }
0x2e98   : > { %3663 = vmatpush3.msra.mxu1 %v3050_v7 }
0x2e99   : > { %3664 = vmatprep.subr.mxu1 %v3049_v57 }
0x2e9a   : > { %3665 = vmatpush3.msra.mxu1 %v3049_v57 }
0x2e9b   : > { %3666 = vmatprep.subr.mxu1 %v3048_v8 }
0x2e9c   : > { %3667 = vmatpush3.msra.mxu1 %v3048_v8 }
0x2f55   : > { %v3648_v62 = vpop.f32.mrf.mxu1 }
0x2f56   : > { %v2949_v63 = vadd.f32 %v3648_v62, %v3250_v61 }
0x2f57   : > { %v2943_v55 = vpop.f32.mrf.mxu1 }
0x2f58   : > { %v2944_v2 = vadd.f32 %v3250_v61, %v2943_v55  ;;  %v2953_v56 = vmax.f32 %v2949_v63, 0.0 }
0x2f5a   : > { %v2952_v4 = vmax.f32 %v2944_v2, 0.0 }
0x2f5c   : > { %3657 = vmatprep.mubr.msk.f32.mxu0 %vm608_vm4, %v2952_v4 }
0x2f5d   : > { %3658 = vmatmul.mubr.msk.f32.vlgmr.msra.gmra.mxu0 %vm608_vm4, %v2953_v56 }
0x301d   : > { %v3659_v10 = vpop.f32.mrf.mxu0 }
0x301e   : > { %v3043_v12 = vadd.f32 %v3659_v10, %v3253_v58 }
0x301f   : > { %v3037_v13 = vpop.f32.mrf.mxu0 }
0x3020   : > { %v3038_v14 = vadd.f32 %v3253_v58, %v3037_v13  ;;  %v3047_v17 = vmax.f32 %v3043_v12, 0.0 }
0x3022   : > { %v3046_v16 = vmax.f32 %v3038_v14, 0.0 }
0x3024   : > { %3668 = vmatprep.mubr.msk.f32.mxu1 %vm608_vm4, %v3046_v16 }
0x3025   : > { %3669 = vmatmul.mubr.msk.f32.vlgmr.msra.gmra.mxu1 %vm608_vm4, %v3047_v17 }
0x30e5   : > { %v3670_v19 = vpop.f32.mrf.mxu1 }
0x30e6   : > { %v3137_v20 = vadd.f32 %v3670_v19, %v3256_v9 }
0x30e7   : > { %v3131_v21 = vpop.f32.mrf.mxu1 }
0x30e8   : > { %3142 = vst.msk [vmem:[%s548_s23 + $0x8] sm:$0xff] %vm3140_vm2, %v3137_v20  ;;  %v3132_v22 = vadd.f32 %v3256_v9, %v3131_v21 }
0x30ea   : > { %3141 = vst.msk [vmem:[%s548_s23] sm:$0xff] %vm3140_vm2, %v3132_v22 }
0x30eb PF: > { %s27_s24 = sadd.s32 1, %s3795_s24  }
0x30ec   : > { %p24_p4 = scmp.ge.s32.totalorder %s27_s24, 4  }
0x30ee   :  { %26 = sbr.rel (!%p24_p4) target bundleno = 3 (0x3), region = 118 }

</bundles_post_ra>
